<compile_context>
chip_gen: v7x
topology: tpu7x:2x2x1
jax: 0.10.0
libtpu: 0.0.40
codegen_flags: <defaults>
</compile_context>

<pallas_src>
import functools
import math

import jax
import jax.numpy as jnp
from jax.experimental import pallas as pl
from jax.experimental.pallas import tpu as pltpu

# ----------------------------- config ---------------------------------------
VOCAB = 100
HIDDEN = 32
NUM_HEADS = 2
HEAD_DIM = HIDDEN // NUM_HEADS
NUM_LAYERS = 2
INTERMEDIATE = 64
MAX_POS = 16
TYPE_VOCAB = 2
NUM_CLASSES = 3
CLS_PAD = 128          # lane-dense classifier output width (sliced to NUM_CLASSES in wrapper)
LN_EPS = 1e-12

_VMEM = pl.BlockSpec(memory_space=pltpu.MemorySpace.VMEM)


# ----------------------------- fused kernel ---------------------------------
def _fused_bert_kernel(
    ids_ref, types_ref, mask_ref,
    word_ref, pos_ref, type_tab_ref, emb_g_ref, emb_b_ref,
    wqkv_ref, bqkv_ref, wo_ref, bo_ref, ln1g_ref, ln1b_ref,
    w1_ref, b1_ref, w2_ref, b2_ref, ln2g_ref, ln2b_ref,
    pool_w_ref, pool_b_ref, cls_w_ref, cls_b_ref,
    logits_ref,
    *, batch, seq, num_heads, head_dim, num_layers, scale):
  """Full BERT-classifier forward; all activations stay VMEM/vreg-resident."""
  hidden = num_heads * head_dim
  bs = batch * seq

  def layer_norm(h, g, b):
    mu = jnp.mean(h, axis=-1, keepdims=True)
    var = jnp.mean((h - mu) ** 2, axis=-1, keepdims=True)
    return (h - mu) * jax.lax.rsqrt(var + LN_EPS) * g + b

  # ---- embeddings, fused in-kernel (no XLA gathers / HBM activation round-trip) ----
  ids = ids_ref[...]                                          # (BS, 1) int32
  vocab_iota = jax.lax.broadcasted_iota(jnp.int32, (bs, VOCAB), 1)
  word_onehot = (ids == vocab_iota).astype(jnp.float32)       # (BS, VOCAB)
  word_part = jnp.dot(word_onehot, word_ref[...],
                      preferred_element_type=jnp.float32)     # (BS, H)

  pos_slice = pos_ref[0:seq, :]                               # positions 0..S-1 (static)
  pos_part = jnp.concatenate([pos_slice] * batch, axis=0)     # (BS, H)

  tt = types_ref[...].astype(jnp.float32)                     # (BS, 1), type vocab == 2
  type_part = type_tab_ref[0:1, :] * (1.0 - tt) + type_tab_ref[1:2, :] * tt

  x = layer_norm(word_part + pos_part + type_part, emb_g_ref[...], emb_b_ref[...])

  # Additive attention-mask bias built from the raw int mask.
  bias = (1.0 - mask_ref[...].astype(jnp.float32)) * -1e9     # (B, 1, S)

  for l in range(num_layers):                                 # static unroll (2 layers)
    wqkv_l = wqkv_ref[l]
    wo_l = wo_ref[l]

    # Fused QKV projection: one [BS, 3H] matmul (bf16 operands, f32 accumulate).
    qkv = jnp.dot(x.astype(jnp.bfloat16), wqkv_l,
                  preferred_element_type=jnp.float32) + bqkv_ref[l]

    # Per-head attention, batched over batch via 3-D einsums; head outputs folded
    # straight into the output projection (no ctx scratch, no lane concatenation).
    attn_out = bo_ref[l]                                      # (1, H) -> broadcasts
    for h in range(num_heads):
      c0 = h * head_dim
      q = (qkv[:, c0:c0 + head_dim] * scale).reshape(batch, seq, head_dim)
      k = qkv[:, hidden + c0:hidden + c0 + head_dim].reshape(batch, seq, head_dim)
      v = qkv[:, 2 * hidden + c0:2 * hidden + c0 + head_dim].reshape(batch, seq, head_dim)

      s = jnp.einsum('bqd,bkd->bqk', q, k,
                     preferred_element_type=jnp.float32) + bias        # (B, S, S)
      m = jnp.max(s, axis=-1, keepdims=True)
      p = jnp.exp(s - m)
      p = p * pl.reciprocal(jnp.sum(p, axis=-1, keepdims=True), approx=True)
      ctx = jnp.einsum('bqk,bkd->bqd', p, v,
                       preferred_element_type=jnp.float32).reshape(bs, head_dim)
      attn_out = attn_out + jnp.dot(ctx.astype(jnp.bfloat16),
                                    wo_l[c0:c0 + head_dim, :],
                                    preferred_element_type=jnp.float32)

    x = layer_norm(attn_out + x, ln1g_ref[l], ln1b_ref[l])

    ffn = jnp.dot(x.astype(jnp.bfloat16), w1_ref[l],
                  preferred_element_type=jnp.float32) + b1_ref[l]
    # TODO(synk): HF BERT uses exact erf-GELU; tanh approximation keeps Mosaic lowering simple.
    ffn = jax.nn.gelu(ffn, approximate=True)
    ffn = jnp.dot(ffn.astype(jnp.bfloat16), w2_ref[l],
                  preferred_element_type=jnp.float32) + b2_ref[l]
    x = layer_norm(ffn + x, ln2g_ref[l], ln2b_ref[l])

  # Pooler + classifier on the [CLS] rows only (rows 0, S, 2S, ...).
  x_cls = jnp.concatenate([x[b * seq:b * seq + 1, :] for b in range(batch)], axis=0)  # (B, H)
  pooled = jnp.tanh(jnp.dot(x_cls.astype(jnp.bfloat16), pool_w_ref[...],
                            preferred_element_type=jnp.float32) + pool_b_ref[...])
  # nn.Dropout(0.1) is identity at inference (eval mode) — matches PyTorch eval forward.
  logits = jnp.dot(pooled.astype(jnp.bfloat16), cls_w_ref[...],
                   preferred_element_type=jnp.float32) + cls_b_ref[...]               # (B, 128)
  logits_ref[...] = logits.astype(logits_ref.dtype)


# ----------------------------- parameters -----------------------------------
def init_params(key):
  def normal(k, shape, dtype=jnp.float32):
    return (0.02 * jax.random.normal(k, shape)).astype(dtype)

  keys = iter(jax.random.split(key, 16))
  L, H, I = NUM_LAYERS, HIDDEN, INTERMEDIATE
  # Classifier weight zero-padded to a lane-dense width; extra columns stay exactly zero.
  cls_w = jnp.zeros((H, CLS_PAD), jnp.float32).at[:, :NUM_CLASSES].set(
      normal(next(keys), (H, NUM_CLASSES)))
  return {
      # Embedding tables stay f32 so the in-kernel one-hot gather reproduces exact values.
      "word_emb": normal(next(keys), (VOCAB, H)),
      "pos_emb": normal(next(keys), (MAX_POS, H)),
      "type_emb": normal(next(keys), (TYPE_VOCAB, H)),
      "emb_ln_g": jnp.ones((1, H), jnp.float32),
      "emb_ln_b": jnp.zeros((1, H), jnp.float32),
      # Per-layer matmul weights stacked along a leading layer axis, stored bf16 (MXU-native).
      "wqkv": normal(next(keys), (L, H, 3 * H), jnp.bfloat16),
      "bqkv": jnp.zeros((L, 1, 3 * H), jnp.float32),
      "wo": normal(next(keys), (L, H, H), jnp.bfloat16),
      "bo": jnp.zeros((L, 1, H), jnp.float32),
      "ln1_g": jnp.ones((L, 1, H), jnp.float32),
      "ln1_b": jnp.zeros((L, 1, H), jnp.float32),
      "w1": normal(next(keys), (L, H, I), jnp.bfloat16),
      "b1": jnp.zeros((L, 1, I), jnp.float32),
      "w2": normal(next(keys), (L, I, H), jnp.bfloat16),
      "b2": jnp.zeros((L, 1, H), jnp.float32),
      "ln2_g": jnp.ones((L, 1, H), jnp.float32),
      "ln2_b": jnp.zeros((L, 1, H), jnp.float32),
      "pool_w": normal(next(keys), (H, H), jnp.bfloat16),
      "pool_b": jnp.zeros((1, H), jnp.float32),
      "cls_w": cls_w.astype(jnp.bfloat16),
      "cls_b": jnp.zeros((1, CLS_PAD), jnp.float32),
  }


# ----------------------------- forward --------------------------------------
@jax.jit
def bert_classifier_forward(params, input_ids, attention_mask, token_type_ids):
  B, S = input_ids.shape

  # Only trivial int reshapes on the XLA side; everything else runs inside the one kernel.
  ids = input_ids.astype(jnp.int32).reshape(B * S, 1)
  types = token_type_ids.astype(jnp.int32).reshape(B * S, 1)
  mask = attention_mask.astype(jnp.int32).reshape(B, 1, S)

  kernel = functools.partial(
      _fused_bert_kernel, batch=B, seq=S, num_heads=NUM_HEADS,
      head_dim=HEAD_DIM, num_layers=NUM_LAYERS, scale=1.0 / math.sqrt(HEAD_DIM))

  args = (ids, types, mask,
          params["word_emb"], params["pos_emb"], params["type_emb"],
          params["emb_ln_g"], params["emb_ln_b"],
          params["wqkv"], params["bqkv"], params["wo"], params["bo"],
          params["ln1_g"], params["ln1_b"],
          params["w1"], params["b1"], params["w2"], params["b2"],
          params["ln2_g"], params["ln2_b"],
          params["pool_w"], params["pool_b"], params["cls_w"], params["cls_b"])

  # Advisory cost estimate so XLA schedules around the custom call.
  bs = B * S
  flops = 2 * bs * VOCAB * HIDDEN
  flops += NUM_LAYERS * (2 * bs * HIDDEN * 3 * HIDDEN
                         + NUM_HEADS * 4 * B * S * S * HEAD_DIM
                         + 2 * bs * HIDDEN * HIDDEN
                         + 4 * bs * HIDDEN * INTERMEDIATE)
  flops += 2 * B * HIDDEN * HIDDEN + 2 * B * HIDDEN * CLS_PAD
  transcendentals = NUM_LAYERS * (NUM_HEADS * B * S * S + bs * INTERMEDIATE) + B * HIDDEN
  bytes_accessed = sum(int(a.size) * a.dtype.itemsize for a in args) + B * CLS_PAD * 4

  logits_full = pl.pallas_call(
      kernel,
      out_shape=jax.ShapeDtypeStruct((B, CLS_PAD), jnp.float32),
      in_specs=[_VMEM] * len(args),
      out_specs=_VMEM,
      cost_estimate=pl.CostEstimate(flops=int(flops),
                                    transcendentals=int(transcendentals),
                                    bytes_accessed=int(bytes_accessed)),
  )(*args)

  # Only the real class columns (CLS rows already selected inside the kernel).
  return logits_full[:, :NUM_CLASSES]


# ----------------------------- main -----------------------------------------
if __name__ == "__main__":
  B, S = 2, 8
  root = jax.random.PRNGKey(0)
  k_params, k_ids, k_types = jax.random.split(root, 3)

  params = init_params(k_params)
  input_ids = jax.random.randint(k_ids, (B, S), 0, VOCAB, dtype=jnp.int32)
  token_type_ids = jax.random.randint(k_types, (B, S), 0, TYPE_VOCAB, dtype=jnp.int32)
  attention_mask = jnp.ones((B, S), jnp.int32).at[1, -2:].set(0)  # pad last 2 tokens of row 1

  logits = bert_classifier_forward(params, input_ids, attention_mask, token_type_ids)
  jax.block_until_ready(logits)
  assert logits.shape == (B, NUM_CLASSES)
  print("KERNEL_OK")
</pallas_src>

<mosaic_0001>
module attributes {stable_mosaic.version = 11 : i64} {
  func.func @_fused_bert_kernel(%arg0: memref<16x1xi32, #tpu.memory_space<vmem>>, %arg1: memref<16x1xi32, #tpu.memory_space<vmem>>, %arg2: memref<2x1x8xi32, #tpu.memory_space<vmem>>, %arg3: memref<100x32xf32, #tpu.memory_space<vmem>>, %arg4: memref<16x32xf32, #tpu.memory_space<vmem>>, %arg5: memref<2x32xf32, #tpu.memory_space<vmem>>, %arg6: memref<1x32xf32, #tpu.memory_space<vmem>>, %arg7: memref<1x32xf32, #tpu.memory_space<vmem>>, %arg8: memref<2x32x96xbf16, #tpu.memory_space<vmem>>, %arg9: memref<2x1x96xf32, #tpu.memory_space<vmem>>, %arg10: memref<2x32x32xbf16, #tpu.memory_space<vmem>>, %arg11: memref<2x1x32xf32, #tpu.memory_space<vmem>>, %arg12: memref<2x1x32xf32, #tpu.memory_space<vmem>>, %arg13: memref<2x1x32xf32, #tpu.memory_space<vmem>>, %arg14: memref<2x32x64xbf16, #tpu.memory_space<vmem>>, %arg15: memref<2x1x64xf32, #tpu.memory_space<vmem>>, %arg16: memref<2x64x32xbf16, #tpu.memory_space<vmem>>, %arg17: memref<2x1x32xf32, #tpu.memory_space<vmem>>, %arg18: memref<2x1x32xf32, #tpu.memory_space<vmem>>, %arg19: memref<2x1x32xf32, #tpu.memory_space<vmem>>, %arg20: memref<32x32xbf16, #tpu.memory_space<vmem>>, %arg21: memref<1x32xf32, #tpu.memory_space<vmem>>, %arg22: memref<32x128xbf16, #tpu.memory_space<vmem>>, %arg23: memref<1x128xf32, #tpu.memory_space<vmem>>, %arg24: memref<2x128xf32, #tpu.memory_space<vmem>>) attributes {dimension_semantics = [], scalar_prefetch = 0 : i64, scratch_operands = 0 : i64, tpu.core_type = #tpu.core_type<tc>} {
    %c0 = arith.constant 0 : index
    %c0_0 = arith.constant 0 : index
    %0 = vector.load %arg0[%c0, %c0_0] : memref<16x1xi32, #tpu.memory_space<vmem>>, vector<16x1xi32>
    %1 = tpu.iota {dimensions = array<i32: 1>} : vector<16x100xi32>
    %2 = vector.broadcast %0 : vector<16x1xi32> to vector<16x100xi32>
    %3 = arith.cmpi eq, %2, %1 : vector<16x100xi32>
    %4 = arith.extui %3 : vector<16x100xi1> to vector<16x100xi32>
    %5 = arith.sitofp %4 : vector<16x100xi32> to vector<16x100xf32>
    %c0_1 = arith.constant 0 : index
    %c0_2 = arith.constant 0 : index
    %6 = vector.load %arg3[%c0_1, %c0_2] : memref<100x32xf32, #tpu.memory_space<vmem>>, vector<100x32xf32>
    %cst = arith.constant dense<0.000000e+00> : vector<16x32xf32>
    %7 = tpu.matmul %5, %6, %cst {dimension_numbers = #tpu.dot_dimension_numbers<[1], [0], [0], [1], [0, 0, 1, 1], [], []>} : vector<16x100xf32>, vector<100x32xf32>, vector<16x32xf32> -> vector<16x32xf32>
    %c0_3 = arith.constant 0 : index
    %c0_4 = arith.constant 0 : index
    %8 = vector.load %arg4[%c0_3, %c0_4] : memref<16x32xf32, #tpu.memory_space<vmem>>, vector<8x32xf32>
    %9 = tpu.concatenate %8, %8 in 0 : vector<8x32xf32>, vector<8x32xf32> -> vector<16x32xf32>
    %c0_5 = arith.constant 0 : index
    %c0_6 = arith.constant 0 : index
    %10 = vector.load %arg1[%c0_5, %c0_6] : memref<16x1xi32, #tpu.memory_space<vmem>>, vector<16x1xi32>
    %11 = arith.sitofp %10 : vector<16x1xi32> to vector<16x1xf32>
    %c0_7 = arith.constant 0 : index
    %c0_8 = arith.constant 0 : index
    %12 = vector.load %arg5[%c0_7, %c0_8] : memref<2x32xf32, #tpu.memory_space<vmem>>, vector<1x32xf32>
    %cst_9 = arith.constant 1.000000e+00 : f32
    %13 = vector.broadcast %cst_9 : f32 to vector<16x1xf32>
    %14 = arith.subf %13, %11 : vector<16x1xf32>
    %15 = vector.broadcast %12 : vector<1x32xf32> to vector<16x32xf32>
    %16 = vector.broadcast %14 : vector<16x1xf32> to vector<16x32xf32>
    %17 = arith.mulf %15, %16 : vector<16x32xf32>
    %c1 = arith.constant 1 : index
    %c0_10 = arith.constant 0 : index
    %18 = vector.load %arg5[%c1, %c0_10] : memref<2x32xf32, #tpu.memory_space<vmem>>, vector<1x32xf32>
    %19 = vector.broadcast %18 : vector<1x32xf32> to vector<16x32xf32>
    %20 = vector.broadcast %11 : vector<16x1xf32> to vector<16x32xf32>
    %21 = arith.mulf %19, %20 : vector<16x32xf32>
    %22 = arith.addf %17, %21 : vector<16x32xf32>
    %23 = arith.addf %7, %9 : vector<16x32xf32>
    %24 = arith.addf %23, %22 : vector<16x32xf32>
    %c0_11 = arith.constant 0 : index
    %c0_12 = arith.constant 0 : index
    %25 = vector.load %arg6[%c0_11, %c0_12] : memref<1x32xf32, #tpu.memory_space<vmem>>, vector<1x32xf32>
    %c0_13 = arith.constant 0 : index
    %c0_14 = arith.constant 0 : index
    %26 = vector.load %arg7[%c0_13, %c0_14] : memref<1x32xf32, #tpu.memory_space<vmem>>, vector<1x32xf32>
    %cst_15 = arith.constant dense<0.000000e+00> : vector<16xf32>
    %27 = vector.multi_reduction <add>, %24, %cst_15 [1] : vector<16x32xf32> to vector<16xf32>
    %28 = vector.shape_cast %27 : vector<16xf32> to vector<16x1xf32>
    %cst_16 = arith.constant 3.200000e+01 : f32
    %29 = vector.broadcast %cst_16 : f32 to vector<16x1xf32>
    %30 = arith.divf %28, %29 : vector<16x1xf32>
    %31 = vector.broadcast %30 : vector<16x1xf32> to vector<16x32xf32>
    %32 = arith.subf %24, %31 : vector<16x32xf32>
    %33 = arith.mulf %32, %32 : vector<16x32xf32>
    %cst_17 = arith.constant dense<0.000000e+00> : vector<16xf32>
    %34 = vector.multi_reduction <add>, %33, %cst_17 [1] : vector<16x32xf32> to vector<16xf32>
    %35 = vector.shape_cast %34 : vector<16xf32> to vector<16x1xf32>
    %cst_18 = arith.constant 3.200000e+01 : f32
    %36 = vector.broadcast %cst_18 : f32 to vector<16x1xf32>
    %37 = arith.divf %35, %36 : vector<16x1xf32>
    %38 = vector.broadcast %30 : vector<16x1xf32> to vector<16x32xf32>
    %39 = arith.subf %24, %38 : vector<16x32xf32>
    %cst_19 = arith.constant 9.99999996E-13 : f32
    %40 = vector.broadcast %cst_19 : f32 to vector<16x1xf32>
    %41 = arith.addf %37, %40 : vector<16x1xf32>
    %42 = math.rsqrt %41 : vector<16x1xf32>
    %43 = vector.broadcast %42 : vector<16x1xf32> to vector<16x32xf32>
    %44 = arith.mulf %39, %43 : vector<16x32xf32>
    %45 = vector.broadcast %25 : vector<1x32xf32> to vector<16x32xf32>
    %46 = arith.mulf %44, %45 : vector<16x32xf32>
    %47 = vector.broadcast %26 : vector<1x32xf32> to vector<16x32xf32>
    %48 = arith.addf %46, %47 : vector<16x32xf32>
    %c0_20 = arith.constant 0 : index
    %c0_21 = arith.constant 0 : index
    %c0_22 = arith.constant 0 : index
    %49 = vector.load %arg2[%c0_20, %c0_21, %c0_22] : memref<2x1x8xi32, #tpu.memory_space<vmem>>, vector<2x1x8xi32>
    %50 = arith.sitofp %49 : vector<2x1x8xi32> to vector<2x1x8xf32>
    %cst_23 = arith.constant 1.000000e+00 : f32
    %51 = vector.broadcast %cst_23 : f32 to vector<2x1x8xf32>
    %52 = arith.subf %51, %50 : vector<2x1x8xf32>
    %cst_24 = arith.constant -1.000000e+09 : f32
    %53 = vector.broadcast %cst_24 : f32 to vector<2x1x8xf32>
    %54 = arith.mulf %52, %53 : vector<2x1x8xf32>
    %c0_25 = arith.constant 0 : index
    %c0_26 = arith.constant 0 : index
    %c0_27 = arith.constant 0 : index
    %55 = vector.load %arg8[%c0_25, %c0_26, %c0_27] : memref<2x32x96xbf16, #tpu.memory_space<vmem>>, vector<1x32x96xbf16>
    %56 = vector.shape_cast %55 : vector<1x32x96xbf16> to vector<32x96xbf16>
    %c0_28 = arith.constant 0 : index
    %c0_29 = arith.constant 0 : index
    %c0_30 = arith.constant 0 : index
    %57 = vector.load %arg10[%c0_28, %c0_29, %c0_30] : memref<2x32x32xbf16, #tpu.memory_space<vmem>>, vector<1x32x32xbf16>
    %58 = vector.shape_cast %57 : vector<1x32x32xbf16> to vector<32x32xbf16>
    %59 = arith.truncf %48 : vector<16x32xf32> to vector<16x32xbf16>
    %cst_31 = arith.constant dense<0.000000e+00> : vector<16x96xf32>
    %60 = tpu.matmul %59, %56, %cst_31 {dimension_numbers = #tpu.dot_dimension_numbers<[1], [0], [0], [1], [0, 0, 1, 1], [], []>} : vector<16x32xbf16>, vector<32x96xbf16>, vector<16x96xf32> -> vector<16x96xf32>
    %c0_32 = arith.constant 0 : index
    %c0_33 = arith.constant 0 : index
    %c0_34 = arith.constant 0 : index
    %61 = vector.load %arg9[%c0_32, %c0_33, %c0_34] : memref<2x1x96xf32, #tpu.memory_space<vmem>>, vector<1x1x96xf32>
    %62 = vector.shape_cast %61 : vector<1x1x96xf32> to vector<1x96xf32>
    %63 = vector.broadcast %62 : vector<1x96xf32> to vector<16x96xf32>
    %64 = arith.addf %60, %63 : vector<16x96xf32>
    %c0_35 = arith.constant 0 : index
    %c0_36 = arith.constant 0 : index
    %c0_37 = arith.constant 0 : index
    %65 = vector.load %arg11[%c0_35, %c0_36, %c0_37] : memref<2x1x32xf32, #tpu.memory_space<vmem>>, vector<1x1x32xf32>
    %66 = vector.shape_cast %65 : vector<1x1x32xf32> to vector<1x32xf32>
    %67 = vector.extract_strided_slice %64 {offsets = [0, 0], sizes = [16, 16], strides = [1, 1]} : vector<16x96xf32> to vector<16x16xf32>
    %cst_38 = arith.constant 2.500000e-01 : f32
    %68 = vector.broadcast %cst_38 : f32 to vector<16x16xf32>
    %69 = arith.mulf %67, %68 : vector<16x16xf32>
    %70 = vector.shape_cast %69 : vector<16x16xf32> to vector<2x8x16xf32>
    %71 = vector.extract_strided_slice %64 {offsets = [0, 32], sizes = [16, 16], strides = [1, 1]} : vector<16x96xf32> to vector<16x16xf32>
    %72 = vector.shape_cast %71 : vector<16x16xf32> to vector<2x8x16xf32>
    %73 = vector.extract_strided_slice %64 {offsets = [0, 64], sizes = [16, 16], strides = [1, 1]} : vector<16x96xf32> to vector<16x16xf32>
    %74 = vector.shape_cast %73 : vector<16x16xf32> to vector<2x8x16xf32>
    "tpu.trace_start"() <{level = 10 : i32, message = "bqd,bkd->bqk"}> : () -> ()
    %cst_39 = arith.constant dense<0.000000e+00> : vector<2x8x8xf32>
    %75 = tpu.matmul %70, %72, %cst_39 {dimension_numbers = #tpu.dot_dimension_numbers<[2], [2], [1], [1], [0, 0, 0, 1, 1, 1], [0], [0]>} : vector<2x8x16xf32>, vector<2x8x16xf32>, vector<2x8x8xf32> -> vector<2x8x8xf32>
    "tpu.trace_stop"() : () -> ()
    %76 = vector.broadcast %54 : vector<2x1x8xf32> to vector<2x8x8xf32>
    %77 = arith.addf %75, %76 : vector<2x8x8xf32>
    %cst_40 = arith.constant dense<0xFF800000> : vector<2x8xf32>
    %78 = vector.multi_reduction <maximumf>, %77, %cst_40 [2] : vector<2x8x8xf32> to vector<2x8xf32>
    %79 = vector.shape_cast %78 : vector<2x8xf32> to vector<2x8x1xf32>
    %80 = vector.broadcast %79 : vector<2x8x1xf32> to vector<2x8x8xf32>
    %81 = arith.subf %77, %80 : vector<2x8x8xf32>
    %82 = math.exp %81 : vector<2x8x8xf32>
    %cst_41 = arith.constant dense<0.000000e+00> : vector<2x8xf32>
    %83 = vector.multi_reduction <add>, %82, %cst_41 [2] : vector<2x8x8xf32> to vector<2x8xf32>
    %84 = vector.shape_cast %83 : vector<2x8xf32> to vector<2x8x1xf32>
    %85 = tpu.reciprocal %84 {approx = true} : vector<2x8x1xf32> -> vector<2x8x1xf32>
    %86 = vector.broadcast %85 : vector<2x8x1xf32> to vector<2x8x8xf32>
    %87 = arith.mulf %82, %86 : vector<2x8x8xf32>
    "tpu.trace_start"() <{level = 10 : i32, message = "bqk,bkd->bqd"}> : () -> ()
    %cst_42 = arith.constant dense<0.000000e+00> : vector<2x8x16xf32>
    %88 = tpu.matmul %87, %74, %cst_42 {dimension_numbers = #tpu.dot_dimension_numbers<[2], [1], [1], [2], [0, 0, 0, 1, 1, 2], [0], [0]>} : vector<2x8x8xf32>, vector<2x8x16xf32>, vector<2x8x16xf32> -> vector<2x8x16xf32>
    "tpu.trace_stop"() : () -> ()
    %89 = vector.shape_cast %88 : vector<2x8x16xf32> to vector<16x16xf32>
    %90 = arith.truncf %89 : vector<16x16xf32> to vector<16x16xbf16>
    %91 = vector.extract_strided_slice %58 {offsets = [0, 0], sizes = [16, 32], strides = [1, 1]} : vector<32x32xbf16> to vector<16x32xbf16>
    %cst_43 = arith.constant dense<0.000000e+00> : vector<16x32xf32>
    %92 = tpu.matmul %90, %91, %cst_43 {dimension_numbers = #tpu.dot_dimension_numbers<[1], [0], [0], [1], [0, 0, 1, 1], [], []>} : vector<16x16xbf16>, vector<16x32xbf16>, vector<16x32xf32> -> vector<16x32xf32>
    %93 = vector.broadcast %66 : vector<1x32xf32> to vector<16x32xf32>
    %94 = arith.addf %93, %92 : vector<16x32xf32>
    %95 = vector.extract_strided_slice %64 {offsets = [0, 16], sizes = [16, 16], strides = [1, 1]} : vector<16x96xf32> to vector<16x16xf32>
    %cst_44 = arith.constant 2.500000e-01 : f32
    %96 = vector.broadcast %cst_44 : f32 to vector<16x16xf32>
    %97 = arith.mulf %95, %96 : vector<16x16xf32>
    %98 = vector.shape_cast %97 : vector<16x16xf32> to vector<2x8x16xf32>
    %99 = vector.extract_strided_slice %64 {offsets = [0, 48], sizes = [16, 16], strides = [1, 1]} : vector<16x96xf32> to vector<16x16xf32>
    %100 = vector.shape_cast %99 : vector<16x16xf32> to vector<2x8x16xf32>
    %101 = vector.extract_strided_slice %64 {offsets = [0, 80], sizes = [16, 16], strides = [1, 1]} : vector<16x96xf32> to vector<16x16xf32>
    %102 = vector.shape_cast %101 : vector<16x16xf32> to vector<2x8x16xf32>
    "tpu.trace_start"() <{level = 10 : i32, message = "bqd,bkd->bqk"}> : () -> ()
    %cst_45 = arith.constant dense<0.000000e+00> : vector<2x8x8xf32>
    %103 = tpu.matmul %98, %100, %cst_45 {dimension_numbers = #tpu.dot_dimension_numbers<[2], [2], [1], [1], [0, 0, 0, 1, 1, 1], [0], [0]>} : vector<2x8x16xf32>, vector<2x8x16xf32>, vector<2x8x8xf32> -> vector<2x8x8xf32>
    "tpu.trace_stop"() : () -> ()
    %104 = vector.broadcast %54 : vector<2x1x8xf32> to vector<2x8x8xf32>
    %105 = arith.addf %103, %104 : vector<2x8x8xf32>
    %cst_46 = arith.constant dense<0xFF800000> : vector<2x8xf32>
    %106 = vector.multi_reduction <maximumf>, %105, %cst_46 [2] : vector<2x8x8xf32> to vector<2x8xf32>
    %107 = vector.shape_cast %106 : vector<2x8xf32> to vector<2x8x1xf32>
    %108 = vector.broadcast %107 : vector<2x8x1xf32> to vector<2x8x8xf32>
    %109 = arith.subf %105, %108 : vector<2x8x8xf32>
    %110 = math.exp %109 : vector<2x8x8xf32>
    %cst_47 = arith.constant dense<0.000000e+00> : vector<2x8xf32>
    %111 = vector.multi_reduction <add>, %110, %cst_47 [2] : vector<2x8x8xf32> to vector<2x8xf32>
    %112 = vector.shape_cast %111 : vector<2x8xf32> to vector<2x8x1xf32>
    %113 = tpu.reciprocal %112 {approx = true} : vector<2x8x1xf32> -> vector<2x8x1xf32>
    %114 = vector.broadcast %113 : vector<2x8x1xf32> to vector<2x8x8xf32>
    %115 = arith.mulf %110, %114 : vector<2x8x8xf32>
    "tpu.trace_start"() <{level = 10 : i32, message = "bqk,bkd->bqd"}> : () -> ()
    %cst_48 = arith.constant dense<0.000000e+00> : vector<2x8x16xf32>
    %116 = tpu.matmul %115, %102, %cst_48 {dimension_numbers = #tpu.dot_dimension_numbers<[2], [1], [1], [2], [0, 0, 0, 1, 1, 2], [0], [0]>} : vector<2x8x8xf32>, vector<2x8x16xf32>, vector<2x8x16xf32> -> vector<2x8x16xf32>
    "tpu.trace_stop"() : () -> ()
    %117 = vector.shape_cast %116 : vector<2x8x16xf32> to vector<16x16xf32>
    %118 = arith.truncf %117 : vector<16x16xf32> to vector<16x16xbf16>
    %119 = vector.extract_strided_slice %58 {offsets = [16, 0], sizes = [16, 32], strides = [1, 1]} : vector<32x32xbf16> to vector<16x32xbf16>
    %cst_49 = arith.constant dense<0.000000e+00> : vector<16x32xf32>
    %120 = tpu.matmul %118, %119, %cst_49 {dimension_numbers = #tpu.dot_dimension_numbers<[1], [0], [0], [1], [0, 0, 1, 1], [], []>} : vector<16x16xbf16>, vector<16x32xbf16>, vector<16x32xf32> -> vector<16x32xf32>
    %121 = arith.addf %94, %120 : vector<16x32xf32>
    %122 = arith.addf %121, %48 : vector<16x32xf32>
    %c0_50 = arith.constant 0 : index
    %c0_51 = arith.constant 0 : index
    %c0_52 = arith.constant 0 : index
    %123 = vector.load %arg12[%c0_50, %c0_51, %c0_52] : memref<2x1x32xf32, #tpu.memory_space<vmem>>, vector<1x1x32xf32>
    %124 = vector.shape_cast %123 : vector<1x1x32xf32> to vector<1x32xf32>
    %c0_53 = arith.constant 0 : index
    %c0_54 = arith.constant 0 : index
    %c0_55 = arith.constant 0 : index
    %125 = vector.load %arg13[%c0_53, %c0_54, %c0_55] : memref<2x1x32xf32, #tpu.memory_space<vmem>>, vector<1x1x32xf32>
    %126 = vector.shape_cast %125 : vector<1x1x32xf32> to vector<1x32xf32>
    %cst_56 = arith.constant dense<0.000000e+00> : vector<16xf32>
    %127 = vector.multi_reduction <add>, %122, %cst_56 [1] : vector<16x32xf32> to vector<16xf32>
    %128 = vector.shape_cast %127 : vector<16xf32> to vector<16x1xf32>
    %cst_57 = arith.constant 3.200000e+01 : f32
    %129 = vector.broadcast %cst_57 : f32 to vector<16x1xf32>
    %130 = arith.divf %128, %129 : vector<16x1xf32>
    %131 = vector.broadcast %130 : vector<16x1xf32> to vector<16x32xf32>
    %132 = arith.subf %122, %131 : vector<16x32xf32>
    %133 = arith.mulf %132, %132 : vector<16x32xf32>
    %cst_58 = arith.constant dense<0.000000e+00> : vector<16xf32>
    %134 = vector.multi_reduction <add>, %133, %cst_58 [1] : vector<16x32xf32> to vector<16xf32>
    %135 = vector.shape_cast %134 : vector<16xf32> to vector<16x1xf32>
    %cst_59 = arith.constant 3.200000e+01 : f32
    %136 = vector.broadcast %cst_59 : f32 to vector<16x1xf32>
    %137 = arith.divf %135, %136 : vector<16x1xf32>
    %138 = vector.broadcast %130 : vector<16x1xf32> to vector<16x32xf32>
    %139 = arith.subf %122, %138 : vector<16x32xf32>
    %cst_60 = arith.constant 9.99999996E-13 : f32
    %140 = vector.broadcast %cst_60 : f32 to vector<16x1xf32>
    %141 = arith.addf %137, %140 : vector<16x1xf32>
    %142 = math.rsqrt %141 : vector<16x1xf32>
    %143 = vector.broadcast %142 : vector<16x1xf32> to vector<16x32xf32>
    %144 = arith.mulf %139, %143 : vector<16x32xf32>
    %145 = vector.broadcast %124 : vector<1x32xf32> to vector<16x32xf32>
    %146 = arith.mulf %144, %145 : vector<16x32xf32>
    %147 = vector.broadcast %126 : vector<1x32xf32> to vector<16x32xf32>
    %148 = arith.addf %146, %147 : vector<16x32xf32>
    %149 = arith.truncf %148 : vector<16x32xf32> to vector<16x32xbf16>
    %c0_61 = arith.constant 0 : index
    %c0_62 = arith.constant 0 : index
    %c0_63 = arith.constant 0 : index
    %150 = vector.load %arg14[%c0_61, %c0_62, %c0_63] : memref<2x32x64xbf16, #tpu.memory_space<vmem>>, vector<1x32x64xbf16>
    %151 = vector.shape_cast %150 : vector<1x32x64xbf16> to vector<32x64xbf16>
    %cst_64 = arith.constant dense<0.000000e+00> : vector<16x64xf32>
    %152 = tpu.matmul %149, %151, %cst_64 {dimension_numbers = #tpu.dot_dimension_numbers<[1], [0], [0], [1], [0, 0, 1, 1], [], []>} : vector<16x32xbf16>, vector<32x64xbf16>, vector<16x64xf32> -> vector<16x64xf32>
    %c0_65 = arith.constant 0 : index
    %c0_66 = arith.constant 0 : index
    %c0_67 = arith.constant 0 : index
    %153 = vector.load %arg15[%c0_65, %c0_66, %c0_67] : memref<2x1x64xf32, #tpu.memory_space<vmem>>, vector<1x1x64xf32>
    %154 = vector.shape_cast %153 : vector<1x1x64xf32> to vector<1x64xf32>
    %155 = vector.broadcast %154 : vector<1x64xf32> to vector<16x64xf32>
    %156 = arith.addf %152, %155 : vector<16x64xf32>
    %157 = arith.mulf %156, %156 : vector<16x64xf32>
    %158 = arith.mulf %156, %157 : vector<16x64xf32>
    %cst_68 = arith.constant 4.471500e-02 : f32
    %159 = vector.broadcast %cst_68 : f32 to vector<16x64xf32>
    %160 = arith.mulf %159, %158 : vector<16x64xf32>
    %161 = arith.addf %156, %160 : vector<16x64xf32>
    %cst_69 = arith.constant 0.797884583 : f32
    %162 = vector.broadcast %cst_69 : f32 to vector<16x64xf32>
    %163 = arith.mulf %162, %161 : vector<16x64xf32>
    %164 = math.tanh %163 : vector<16x64xf32>
    %cst_70 = arith.constant 1.000000e+00 : f32
    %165 = vector.broadcast %cst_70 : f32 to vector<16x64xf32>
    %166 = arith.addf %165, %164 : vector<16x64xf32>
    %cst_71 = arith.constant 5.000000e-01 : f32
    %167 = vector.broadcast %cst_71 : f32 to vector<16x64xf32>
    %168 = arith.mulf %167, %166 : vector<16x64xf32>
    %169 = arith.mulf %156, %168 : vector<16x64xf32>
    %170 = arith.truncf %169 : vector<16x64xf32> to vector<16x64xbf16>
    %c0_72 = arith.constant 0 : index
    %c0_73 = arith.constant 0 : index
    %c0_74 = arith.constant 0 : index
    %171 = vector.load %arg16[%c0_72, %c0_73, %c0_74] : memref<2x64x32xbf16, #tpu.memory_space<vmem>>, vector<1x64x32xbf16>
    %172 = vector.shape_cast %171 : vector<1x64x32xbf16> to vector<64x32xbf16>
    %cst_75 = arith.constant dense<0.000000e+00> : vector<16x32xf32>
    %173 = tpu.matmul %170, %172, %cst_75 {dimension_numbers = #tpu.dot_dimension_numbers<[1], [0], [0], [1], [0, 0, 1, 1], [], []>} : vector<16x64xbf16>, vector<64x32xbf16>, vector<16x32xf32> -> vector<16x32xf32>
    %c0_76 = arith.constant 0 : index
    %c0_77 = arith.constant 0 : index
    %c0_78 = arith.constant 0 : index
    %174 = vector.load %arg17[%c0_76, %c0_77, %c0_78] : memref<2x1x32xf32, #tpu.memory_space<vmem>>, vector<1x1x32xf32>
    %175 = vector.shape_cast %174 : vector<1x1x32xf32> to vector<1x32xf32>
    %176 = vector.broadcast %175 : vector<1x32xf32> to vector<16x32xf32>
    %177 = arith.addf %173, %176 : vector<16x32xf32>
    %178 = arith.addf %177, %148 : vector<16x32xf32>
    %c0_79 = arith.constant 0 : index
    %c0_80 = arith.constant 0 : index
    %c0_81 = arith.constant 0 : index
    %179 = vector.load %arg18[%c0_79, %c0_80, %c0_81] : memref<2x1x32xf32, #tpu.memory_space<vmem>>, vector<1x1x32xf32>
    %180 = vector.shape_cast %179 : vector<1x1x32xf32> to vector<1x32xf32>
    %c0_82 = arith.constant 0 : index
    %c0_83 = arith.constant 0 : index
    %c0_84 = arith.constant 0 : index
    %181 = vector.load %arg19[%c0_82, %c0_83, %c0_84] : memref<2x1x32xf32, #tpu.memory_space<vmem>>, vector<1x1x32xf32>
    %182 = vector.shape_cast %181 : vector<1x1x32xf32> to vector<1x32xf32>
    %cst_85 = arith.constant dense<0.000000e+00> : vector<16xf32>
    %183 = vector.multi_reduction <add>, %178, %cst_85 [1] : vector<16x32xf32> to vector<16xf32>
    %184 = vector.shape_cast %183 : vector<16xf32> to vector<16x1xf32>
    %cst_86 = arith.constant 3.200000e+01 : f32
    %185 = vector.broadcast %cst_86 : f32 to vector<16x1xf32>
    %186 = arith.divf %184, %185 : vector<16x1xf32>
    %187 = vector.broadcast %186 : vector<16x1xf32> to vector<16x32xf32>
    %188 = arith.subf %178, %187 : vector<16x32xf32>
    %189 = arith.mulf %188, %188 : vector<16x32xf32>
    %cst_87 = arith.constant dense<0.000000e+00> : vector<16xf32>
    %190 = vector.multi_reduction <add>, %189, %cst_87 [1] : vector<16x32xf32> to vector<16xf32>
    %191 = vector.shape_cast %190 : vector<16xf32> to vector<16x1xf32>
    %cst_88 = arith.constant 3.200000e+01 : f32
    %192 = vector.broadcast %cst_88 : f32 to vector<16x1xf32>
    %193 = arith.divf %191, %192 : vector<16x1xf32>
    %194 = vector.broadcast %186 : vector<16x1xf32> to vector<16x32xf32>
    %195 = arith.subf %178, %194 : vector<16x32xf32>
    %cst_89 = arith.constant 9.99999996E-13 : f32
    %196 = vector.broadcast %cst_89 : f32 to vector<16x1xf32>
    %197 = arith.addf %193, %196 : vector<16x1xf32>
    %198 = math.rsqrt %197 : vector<16x1xf32>
    %199 = vector.broadcast %198 : vector<16x1xf32> to vector<16x32xf32>
    %200 = arith.mulf %195, %199 : vector<16x32xf32>
    %201 = vector.broadcast %180 : vector<1x32xf32> to vector<16x32xf32>
    %202 = arith.mulf %200, %201 : vector<16x32xf32>
    %203 = vector.broadcast %182 : vector<1x32xf32> to vector<16x32xf32>
    %204 = arith.addf %202, %203 : vector<16x32xf32>
    %c1_90 = arith.constant 1 : index
    %c0_91 = arith.constant 0 : index
    %c0_92 = arith.constant 0 : index
    %205 = vector.load %arg8[%c1_90, %c0_91, %c0_92] : memref<2x32x96xbf16, #tpu.memory_space<vmem>>, vector<1x32x96xbf16>
    %206 = vector.shape_cast %205 : vector<1x32x96xbf16> to vector<32x96xbf16>
    %c1_93 = arith.constant 1 : index
    %c0_94 = arith.constant 0 : index
    %c0_95 = arith.constant 0 : index
    %207 = vector.load %arg10[%c1_93, %c0_94, %c0_95] : memref<2x32x32xbf16, #tpu.memory_space<vmem>>, vector<1x32x32xbf16>
    %208 = vector.shape_cast %207 : vector<1x32x32xbf16> to vector<32x32xbf16>
    %209 = arith.truncf %204 : vector<16x32xf32> to vector<16x32xbf16>
    %cst_96 = arith.constant dense<0.000000e+00> : vector<16x96xf32>
    %210 = tpu.matmul %209, %206, %cst_96 {dimension_numbers = #tpu.dot_dimension_numbers<[1], [0], [0], [1], [0, 0, 1, 1], [], []>} : vector<16x32xbf16>, vector<32x96xbf16>, vector<16x96xf32> -> vector<16x96xf32>
    %c1_97 = arith.constant 1 : index
    %c0_98 = arith.constant 0 : index
    %c0_99 = arith.constant 0 : index
    %211 = vector.load %arg9[%c1_97, %c0_98, %c0_99] : memref<2x1x96xf32, #tpu.memory_space<vmem>>, vector<1x1x96xf32>
    %212 = vector.shape_cast %211 : vector<1x1x96xf32> to vector<1x96xf32>
    %213 = vector.broadcast %212 : vector<1x96xf32> to vector<16x96xf32>
    %214 = arith.addf %210, %213 : vector<16x96xf32>
    %c1_100 = arith.constant 1 : index
    %c0_101 = arith.constant 0 : index
    %c0_102 = arith.constant 0 : index
    %215 = vector.load %arg11[%c1_100, %c0_101, %c0_102] : memref<2x1x32xf32, #tpu.memory_space<vmem>>, vector<1x1x32xf32>
    %216 = vector.shape_cast %215 : vector<1x1x32xf32> to vector<1x32xf32>
    %217 = vector.extract_strided_slice %214 {offsets = [0, 0], sizes = [16, 16], strides = [1, 1]} : vector<16x96xf32> to vector<16x16xf32>
    %cst_103 = arith.constant 2.500000e-01 : f32
    %218 = vector.broadcast %cst_103 : f32 to vector<16x16xf32>
    %219 = arith.mulf %217, %218 : vector<16x16xf32>
    %220 = vector.shape_cast %219 : vector<16x16xf32> to vector<2x8x16xf32>
    %221 = vector.extract_strided_slice %214 {offsets = [0, 32], sizes = [16, 16], strides = [1, 1]} : vector<16x96xf32> to vector<16x16xf32>
    %222 = vector.shape_cast %221 : vector<16x16xf32> to vector<2x8x16xf32>
    %223 = vector.extract_strided_slice %214 {offsets = [0, 64], sizes = [16, 16], strides = [1, 1]} : vector<16x96xf32> to vector<16x16xf32>
    %224 = vector.shape_cast %223 : vector<16x16xf32> to vector<2x8x16xf32>
    "tpu.trace_start"() <{level = 10 : i32, message = "bqd,bkd->bqk"}> : () -> ()
    %cst_104 = arith.constant dense<0.000000e+00> : vector<2x8x8xf32>
    %225 = tpu.matmul %220, %222, %cst_104 {dimension_numbers = #tpu.dot_dimension_numbers<[2], [2], [1], [1], [0, 0, 0, 1, 1, 1], [0], [0]>} : vector<2x8x16xf32>, vector<2x8x16xf32>, vector<2x8x8xf32> -> vector<2x8x8xf32>
    "tpu.trace_stop"() : () -> ()
    %226 = vector.broadcast %54 : vector<2x1x8xf32> to vector<2x8x8xf32>
    %227 = arith.addf %225, %226 : vector<2x8x8xf32>
    %cst_105 = arith.constant dense<0xFF800000> : vector<2x8xf32>
    %228 = vector.multi_reduction <maximumf>, %227, %cst_105 [2] : vector<2x8x8xf32> to vector<2x8xf32>
    %229 = vector.shape_cast %228 : vector<2x8xf32> to vector<2x8x1xf32>
    %230 = vector.broadcast %229 : vector<2x8x1xf32> to vector<2x8x8xf32>
    %231 = arith.subf %227, %230 : vector<2x8x8xf32>
    %232 = math.exp %231 : vector<2x8x8xf32>
    %cst_106 = arith.constant dense<0.000000e+00> : vector<2x8xf32>
    %233 = vector.multi_reduction <add>, %232, %cst_106 [2] : vector<2x8x8xf32> to vector<2x8xf32>
    %234 = vector.shape_cast %233 : vector<2x8xf32> to vector<2x8x1xf32>
    %235 = tpu.reciprocal %234 {approx = true} : vector<2x8x1xf32> -> vector<2x8x1xf32>
    %236 = vector.broadcast %235 : vector<2x8x1xf32> to vector<2x8x8xf32>
    %237 = arith.mulf %232, %236 : vector<2x8x8xf32>
    "tpu.trace_start"() <{level = 10 : i32, message = "bqk,bkd->bqd"}> : () -> ()
    %cst_107 = arith.constant dense<0.000000e+00> : vector<2x8x16xf32>
    %238 = tpu.matmul %237, %224, %cst_107 {dimension_numbers = #tpu.dot_dimension_numbers<[2], [1], [1], [2], [0, 0, 0, 1, 1, 2], [0], [0]>} : vector<2x8x8xf32>, vector<2x8x16xf32>, vector<2x8x16xf32> -> vector<2x8x16xf32>
    "tpu.trace_stop"() : () -> ()
    %239 = vector.shape_cast %238 : vector<2x8x16xf32> to vector<16x16xf32>
    %240 = arith.truncf %239 : vector<16x16xf32> to vector<16x16xbf16>
    %241 = vector.extract_strided_slice %208 {offsets = [0, 0], sizes = [16, 32], strides = [1, 1]} : vector<32x32xbf16> to vector<16x32xbf16>
    %cst_108 = arith.constant dense<0.000000e+00> : vector<16x32xf32>
    %242 = tpu.matmul %240, %241, %cst_108 {dimension_numbers = #tpu.dot_dimension_numbers<[1], [0], [0], [1], [0, 0, 1, 1], [], []>} : vector<16x16xbf16>, vector<16x32xbf16>, vector<16x32xf32> -> vector<16x32xf32>
    %243 = vector.broadcast %216 : vector<1x32xf32> to vector<16x32xf32>
    %244 = arith.addf %243, %242 : vector<16x32xf32>
    %245 = vector.extract_strided_slice %214 {offsets = [0, 16], sizes = [16, 16], strides = [1, 1]} : vector<16x96xf32> to vector<16x16xf32>
    %cst_109 = arith.constant 2.500000e-01 : f32
    %246 = vector.broadcast %cst_109 : f32 to vector<16x16xf32>
    %247 = arith.mulf %245, %246 : vector<16x16xf32>
    %248 = vector.shape_cast %247 : vector<16x16xf32> to vector<2x8x16xf32>
    %249 = vector.extract_strided_slice %214 {offsets = [0, 48], sizes = [16, 16], strides = [1, 1]} : vector<16x96xf32> to vector<16x16xf32>
    %250 = vector.shape_cast %249 : vector<16x16xf32> to vector<2x8x16xf32>
    %251 = vector.extract_strided_slice %214 {offsets = [0, 80], sizes = [16, 16], strides = [1, 1]} : vector<16x96xf32> to vector<16x16xf32>
    %252 = vector.shape_cast %251 : vector<16x16xf32> to vector<2x8x16xf32>
    "tpu.trace_start"() <{level = 10 : i32, message = "bqd,bkd->bqk"}> : () -> ()
    %cst_110 = arith.constant dense<0.000000e+00> : vector<2x8x8xf32>
    %253 = tpu.matmul %248, %250, %cst_110 {dimension_numbers = #tpu.dot_dimension_numbers<[2], [2], [1], [1], [0, 0, 0, 1, 1, 1], [0], [0]>} : vector<2x8x16xf32>, vector<2x8x16xf32>, vector<2x8x8xf32> -> vector<2x8x8xf32>
    "tpu.trace_stop"() : () -> ()
    %254 = vector.broadcast %54 : vector<2x1x8xf32> to vector<2x8x8xf32>
    %255 = arith.addf %253, %254 : vector<2x8x8xf32>
    %cst_111 = arith.constant dense<0xFF800000> : vector<2x8xf32>
    %256 = vector.multi_reduction <maximumf>, %255, %cst_111 [2] : vector<2x8x8xf32> to vector<2x8xf32>
    %257 = vector.shape_cast %256 : vector<2x8xf32> to vector<2x8x1xf32>
    %258 = vector.broadcast %257 : vector<2x8x1xf32> to vector<2x8x8xf32>
    %259 = arith.subf %255, %258 : vector<2x8x8xf32>
    %260 = math.exp %259 : vector<2x8x8xf32>
    %cst_112 = arith.constant dense<0.000000e+00> : vector<2x8xf32>
    %261 = vector.multi_reduction <add>, %260, %cst_112 [2] : vector<2x8x8xf32> to vector<2x8xf32>
    %262 = vector.shape_cast %261 : vector<2x8xf32> to vector<2x8x1xf32>
    %263 = tpu.reciprocal %262 {approx = true} : vector<2x8x1xf32> -> vector<2x8x1xf32>
    %264 = vector.broadcast %263 : vector<2x8x1xf32> to vector<2x8x8xf32>
    %265 = arith.mulf %260, %264 : vector<2x8x8xf32>
    "tpu.trace_start"() <{level = 10 : i32, message = "bqk,bkd->bqd"}> : () -> ()
    %cst_113 = arith.constant dense<0.000000e+00> : vector<2x8x16xf32>
    %266 = tpu.matmul %265, %252, %cst_113 {dimension_numbers = #tpu.dot_dimension_numbers<[2], [1], [1], [2], [0, 0, 0, 1, 1, 2], [0], [0]>} : vector<2x8x8xf32>, vector<2x8x16xf32>, vector<2x8x16xf32> -> vector<2x8x16xf32>
    "tpu.trace_stop"() : () -> ()
    %267 = vector.shape_cast %266 : vector<2x8x16xf32> to vector<16x16xf32>
    %268 = arith.truncf %267 : vector<16x16xf32> to vector<16x16xbf16>
    %269 = vector.extract_strided_slice %208 {offsets = [16, 0], sizes = [16, 32], strides = [1, 1]} : vector<32x32xbf16> to vector<16x32xbf16>
    %cst_114 = arith.constant dense<0.000000e+00> : vector<16x32xf32>
    %270 = tpu.matmul %268, %269, %cst_114 {dimension_numbers = #tpu.dot_dimension_numbers<[1], [0], [0], [1], [0, 0, 1, 1], [], []>} : vector<16x16xbf16>, vector<16x32xbf16>, vector<16x32xf32> -> vector<16x32xf32>
    %271 = arith.addf %244, %270 : vector<16x32xf32>
    %272 = arith.addf %271, %204 : vector<16x32xf32>
    %c1_115 = arith.constant 1 : index
    %c0_116 = arith.constant 0 : index
    %c0_117 = arith.constant 0 : index
    %273 = vector.load %arg12[%c1_115, %c0_116, %c0_117] : memref<2x1x32xf32, #tpu.memory_space<vmem>>, vector<1x1x32xf32>
    %274 = vector.shape_cast %273 : vector<1x1x32xf32> to vector<1x32xf32>
    %c1_118 = arith.constant 1 : index
    %c0_119 = arith.constant 0 : index
    %c0_120 = arith.constant 0 : index
    %275 = vector.load %arg13[%c1_118, %c0_119, %c0_120] : memref<2x1x32xf32, #tpu.memory_space<vmem>>, vector<1x1x32xf32>
    %276 = vector.shape_cast %275 : vector<1x1x32xf32> to vector<1x32xf32>
    %cst_121 = arith.constant dense<0.000000e+00> : vector<16xf32>
    %277 = vector.multi_reduction <add>, %272, %cst_121 [1] : vector<16x32xf32> to vector<16xf32>
    %278 = vector.shape_cast %277 : vector<16xf32> to vector<16x1xf32>
    %cst_122 = arith.constant 3.200000e+01 : f32
    %279 = vector.broadcast %cst_122 : f32 to vector<16x1xf32>
    %280 = arith.divf %278, %279 : vector<16x1xf32>
    %281 = vector.broadcast %280 : vector<16x1xf32> to vector<16x32xf32>
    %282 = arith.subf %272, %281 : vector<16x32xf32>
    %283 = arith.mulf %282, %282 : vector<16x32xf32>
    %cst_123 = arith.constant dense<0.000000e+00> : vector<16xf32>
    %284 = vector.multi_reduction <add>, %283, %cst_123 [1] : vector<16x32xf32> to vector<16xf32>
    %285 = vector.shape_cast %284 : vector<16xf32> to vector<16x1xf32>
    %cst_124 = arith.constant 3.200000e+01 : f32
    %286 = vector.broadcast %cst_124 : f32 to vector<16x1xf32>
    %287 = arith.divf %285, %286 : vector<16x1xf32>
    %288 = vector.broadcast %280 : vector<16x1xf32> to vector<16x32xf32>
    %289 = arith.subf %272, %288 : vector<16x32xf32>
    %cst_125 = arith.constant 9.99999996E-13 : f32
    %290 = vector.broadcast %cst_125 : f32 to vector<16x1xf32>
    %291 = arith.addf %287, %290 : vector<16x1xf32>
    %292 = math.rsqrt %291 : vector<16x1xf32>
    %293 = vector.broadcast %292 : vector<16x1xf32> to vector<16x32xf32>
    %294 = arith.mulf %289, %293 : vector<16x32xf32>
    %295 = vector.broadcast %274 : vector<1x32xf32> to vector<16x32xf32>
    %296 = arith.mulf %294, %295 : vector<16x32xf32>
    %297 = vector.broadcast %276 : vector<1x32xf32> to vector<16x32xf32>
    %298 = arith.addf %296, %297 : vector<16x32xf32>
    %299 = arith.truncf %298 : vector<16x32xf32> to vector<16x32xbf16>
    %c1_126 = arith.constant 1 : index
    %c0_127 = arith.constant 0 : index
    %c0_128 = arith.constant 0 : index
    %300 = vector.load %arg14[%c1_126, %c0_127, %c0_128] : memref<2x32x64xbf16, #tpu.memory_space<vmem>>, vector<1x32x64xbf16>
    %301 = vector.shape_cast %300 : vector<1x32x64xbf16> to vector<32x64xbf16>
    %cst_129 = arith.constant dense<0.000000e+00> : vector<16x64xf32>
    %302 = tpu.matmul %299, %301, %cst_129 {dimension_numbers = #tpu.dot_dimension_numbers<[1], [0], [0], [1], [0, 0, 1, 1], [], []>} : vector<16x32xbf16>, vector<32x64xbf16>, vector<16x64xf32> -> vector<16x64xf32>
    %c1_130 = arith.constant 1 : index
    %c0_131 = arith.constant 0 : index
    %c0_132 = arith.constant 0 : index
    %303 = vector.load %arg15[%c1_130, %c0_131, %c0_132] : memref<2x1x64xf32, #tpu.memory_space<vmem>>, vector<1x1x64xf32>
    %304 = vector.shape_cast %303 : vector<1x1x64xf32> to vector<1x64xf32>
    %305 = vector.broadcast %304 : vector<1x64xf32> to vector<16x64xf32>
    %306 = arith.addf %302, %305 : vector<16x64xf32>
    %307 = arith.mulf %306, %306 : vector<16x64xf32>
    %308 = arith.mulf %306, %307 : vector<16x64xf32>
    %cst_133 = arith.constant 4.471500e-02 : f32
    %309 = vector.broadcast %cst_133 : f32 to vector<16x64xf32>
    %310 = arith.mulf %309, %308 : vector<16x64xf32>
    %311 = arith.addf %306, %310 : vector<16x64xf32>
    %cst_134 = arith.constant 0.797884583 : f32
    %312 = vector.broadcast %cst_134 : f32 to vector<16x64xf32>
    %313 = arith.mulf %312, %311 : vector<16x64xf32>
    %314 = math.tanh %313 : vector<16x64xf32>
    %cst_135 = arith.constant 1.000000e+00 : f32
    %315 = vector.broadcast %cst_135 : f32 to vector<16x64xf32>
    %316 = arith.addf %315, %314 : vector<16x64xf32>
    %cst_136 = arith.constant 5.000000e-01 : f32
    %317 = vector.broadcast %cst_136 : f32 to vector<16x64xf32>
    %318 = arith.mulf %317, %316 : vector<16x64xf32>
    %319 = arith.mulf %306, %318 : vector<16x64xf32>
    %320 = arith.truncf %319 : vector<16x64xf32> to vector<16x64xbf16>
    %c1_137 = arith.constant 1 : index
    %c0_138 = arith.constant 0 : index
    %c0_139 = arith.constant 0 : index
    %321 = vector.load %arg16[%c1_137, %c0_138, %c0_139] : memref<2x64x32xbf16, #tpu.memory_space<vmem>>, vector<1x64x32xbf16>
    %322 = vector.shape_cast %321 : vector<1x64x32xbf16> to vector<64x32xbf16>
    %cst_140 = arith.constant dense<0.000000e+00> : vector<16x32xf32>
    %323 = tpu.matmul %320, %322, %cst_140 {dimension_numbers = #tpu.dot_dimension_numbers<[1], [0], [0], [1], [0, 0, 1, 1], [], []>} : vector<16x64xbf16>, vector<64x32xbf16>, vector<16x32xf32> -> vector<16x32xf32>
    %c1_141 = arith.constant 1 : index
    %c0_142 = arith.constant 0 : index
    %c0_143 = arith.constant 0 : index
    %324 = vector.load %arg17[%c1_141, %c0_142, %c0_143] : memref<2x1x32xf32, #tpu.memory_space<vmem>>, vector<1x1x32xf32>
    %325 = vector.shape_cast %324 : vector<1x1x32xf32> to vector<1x32xf32>
    %326 = vector.broadcast %325 : vector<1x32xf32> to vector<16x32xf32>
    %327 = arith.addf %323, %326 : vector<16x32xf32>
    %328 = arith.addf %327, %298 : vector<16x32xf32>
    %c1_144 = arith.constant 1 : index
    %c0_145 = arith.constant 0 : index
    %c0_146 = arith.constant 0 : index
    %329 = vector.load %arg18[%c1_144, %c0_145, %c0_146] : memref<2x1x32xf32, #tpu.memory_space<vmem>>, vector<1x1x32xf32>
    %330 = vector.shape_cast %329 : vector<1x1x32xf32> to vector<1x32xf32>
    %c1_147 = arith.constant 1 : index
    %c0_148 = arith.constant 0 : index
    %c0_149 = arith.constant 0 : index
    %331 = vector.load %arg19[%c1_147, %c0_148, %c0_149] : memref<2x1x32xf32, #tpu.memory_space<vmem>>, vector<1x1x32xf32>
    %332 = vector.shape_cast %331 : vector<1x1x32xf32> to vector<1x32xf32>
    %cst_150 = arith.constant dense<0.000000e+00> : vector<16xf32>
    %333 = vector.multi_reduction <add>, %328, %cst_150 [1] : vector<16x32xf32> to vector<16xf32>
    %334 = vector.shape_cast %333 : vector<16xf32> to vector<16x1xf32>
    %cst_151 = arith.constant 3.200000e+01 : f32
    %335 = vector.broadcast %cst_151 : f32 to vector<16x1xf32>
    %336 = arith.divf %334, %335 : vector<16x1xf32>
    %337 = vector.broadcast %336 : vector<16x1xf32> to vector<16x32xf32>
    %338 = arith.subf %328, %337 : vector<16x32xf32>
    %339 = arith.mulf %338, %338 : vector<16x32xf32>
    %cst_152 = arith.constant dense<0.000000e+00> : vector<16xf32>
    %340 = vector.multi_reduction <add>, %339, %cst_152 [1] : vector<16x32xf32> to vector<16xf32>
    %341 = vector.shape_cast %340 : vector<16xf32> to vector<16x1xf32>
    %cst_153 = arith.constant 3.200000e+01 : f32
    %342 = vector.broadcast %cst_153 : f32 to vector<16x1xf32>
    %343 = arith.divf %341, %342 : vector<16x1xf32>
    %344 = vector.broadcast %336 : vector<16x1xf32> to vector<16x32xf32>
    %345 = arith.subf %328, %344 : vector<16x32xf32>
    %cst_154 = arith.constant 9.99999996E-13 : f32
    %346 = vector.broadcast %cst_154 : f32 to vector<16x1xf32>
    %347 = arith.addf %343, %346 : vector<16x1xf32>
    %348 = math.rsqrt %347 : vector<16x1xf32>
    %349 = vector.broadcast %348 : vector<16x1xf32> to vector<16x32xf32>
    %350 = arith.mulf %345, %349 : vector<16x32xf32>
    %351 = vector.broadcast %330 : vector<1x32xf32> to vector<16x32xf32>
    %352 = arith.mulf %350, %351 : vector<16x32xf32>
    %353 = vector.broadcast %332 : vector<1x32xf32> to vector<16x32xf32>
    %354 = arith.addf %352, %353 : vector<16x32xf32>
    %355 = vector.extract_strided_slice %354 {offsets = [0, 0], sizes = [1, 32], strides = [1, 1]} : vector<16x32xf32> to vector<1x32xf32>
    %356 = vector.extract_strided_slice %354 {offsets = [8, 0], sizes = [1, 32], strides = [1, 1]} : vector<16x32xf32> to vector<1x32xf32>
    %357 = tpu.concatenate %355, %356 in 0 : vector<1x32xf32>, vector<1x32xf32> -> vector<2x32xf32>
    %358 = arith.truncf %357 : vector<2x32xf32> to vector<2x32xbf16>
    %c0_155 = arith.constant 0 : index
    %c0_156 = arith.constant 0 : index
    %359 = vector.load %arg20[%c0_155, %c0_156] : memref<32x32xbf16, #tpu.memory_space<vmem>>, vector<32x32xbf16>
    %cst_157 = arith.constant dense<0.000000e+00> : vector<2x32xf32>
    %360 = tpu.matmul %358, %359, %cst_157 {dimension_numbers = #tpu.dot_dimension_numbers<[1], [0], [0], [1], [0, 0, 1, 1], [], []>} : vector<2x32xbf16>, vector<32x32xbf16>, vector<2x32xf32> -> vector<2x32xf32>
    %c0_158 = arith.constant 0 : index
    %c0_159 = arith.constant 0 : index
    %361 = vector.load %arg21[%c0_158, %c0_159] : memref<1x32xf32, #tpu.memory_space<vmem>>, vector<1x32xf32>
    %362 = vector.broadcast %361 : vector<1x32xf32> to vector<2x32xf32>
    %363 = arith.addf %360, %362 : vector<2x32xf32>
    %364 = math.tanh %363 : vector<2x32xf32>
    %365 = arith.truncf %364 : vector<2x32xf32> to vector<2x32xbf16>
    %c0_160 = arith.constant 0 : index
    %c0_161 = arith.constant 0 : index
    %366 = vector.load %arg22[%c0_160, %c0_161] : memref<32x128xbf16, #tpu.memory_space<vmem>>, vector<32x128xbf16>
    %cst_162 = arith.constant dense<0.000000e+00> : vector<2x128xf32>
    %367 = tpu.matmul %365, %366, %cst_162 {dimension_numbers = #tpu.dot_dimension_numbers<[1], [0], [0], [1], [0, 0, 1, 1], [], []>} : vector<2x32xbf16>, vector<32x128xbf16>, vector<2x128xf32> -> vector<2x128xf32>
    %c0_163 = arith.constant 0 : index
    %c0_164 = arith.constant 0 : index
    %368 = vector.load %arg23[%c0_163, %c0_164] : memref<1x128xf32, #tpu.memory_space<vmem>>, vector<1x128xf32>
    %369 = vector.broadcast %368 : vector<1x128xf32> to vector<2x128xf32>
    %370 = arith.addf %367, %369 : vector<2x128xf32>
    %c0_165 = arith.constant 0 : index
    %c0_166 = arith.constant 0 : index
    %371 = vector.load %arg24[%c0_165, %c0_166] : memref<2x128xf32, #tpu.memory_space<vmem>>, vector<2x128xf32>
    tpu.vector_store %arg24[%c0_165, %c0_166], %370 {strides = array<i32>} : memref<2x128xf32, #tpu.memory_space<vmem>>, vector<2x128xf32>,
    return
  }
}

</mosaic_0001>

<bundles_post_ra>
// kernel: bert_classifier_forward.1
= control target key start
LH: loop header
LB: loop body
LE: loop exit
PB: predicated region body
PF: predicated region fallthrough
CT: control target
= control target key end

     0   :  { %s3826_s0 = inlined_call_operand.vmem [shape: s32[16,1], index: 0, kind: input, shape index: {}]   ;;  %s3827_s1 = inlined_call_operand.vmem [shape: s32[16,1], index: 1, kind: input, shape index: {}]   ;;  %s3828_s2 = inlined_call_operand.vmem [shape: s32[2,1,8], index: 2, kind: input, shape index: {}]   ;;  %s3829_s3 = inlined_call_operand.vmem [shape: f32[100,32], index: 3, kind: input, shape index: {}]   ;;  %s3830_s4 = inlined_call_operand.vmem [shape: f32[16,32], index: 4, kind: input, shape index: {}]   ;;  %s3831_s5 = inlined_call_operand.vmem [shape: f32[2,32], index: 5, kind: input, shape index: {}]   ;;  %s3832_s6 = inlined_call_operand.vmem [shape: f32[1,32], index: 6, kind: input, shape index: {}]   ;;  %s3833_s7 = inlined_call_operand.vmem [shape: f32[1,32], index: 7, kind: input, shape index: {}]   ;;  %s3834_s8 = inlined_call_operand.vmem [shape: bf16[2,32,96], index: 8, kind: input, shape index: {}]   ;;  %s3835_s9 = inlined_call_operand.vmem [shape: f32[2,1,96], index: 9, kind: input, shape index: {}]   ;;  %s3836_s10 = inlined_call_operand.vmem [shape: bf16[2,32,32], index: 10, kind: input, shape index: {}]   ;;  %s3837_s11 = inlined_call_operand.vmem [shape: f32[2,1,32], index: 11, kind: input, shape index: {}]   ;;  %s3838_s12 = inlined_call_operand.vmem [shape: f32[2,1,32], index: 12, kind: input, shape index: {}]   ;;  %s3839_s13 = inlined_call_operand.vmem [shape: f32[2,1,32], index: 13, kind: input, shape index: {}]   ;;  %s3840_s14 = inlined_call_operand.vmem [shape: bf16[2,32,64], index: 14, kind: input, shape index: {}]   ;;  %s3841_s15 = inlined_call_operand.vmem [shape: f32[2,1,64], index: 15, kind: input, shape index: {}]   ;;  %s3842_s16 = inlined_call_operand.vmem [shape: bf16[2,64,32], index: 16, kind: input, shape index: {}]   ;;  %s3843_s17 = inlined_call_operand.vmem [shape: f32[2,1,32], index: 17, kind: input, shape index: {}]   ;;  %s3844_s18 = inlined_call_operand.vmem [shape: f32[2,1,32], index: 18, kind: input, shape index: {}]   ;;  %s3845_s19 = inlined_call_operand.vmem [shape: f32[2,1,32], index: 19, kind: input, shape index: {}]   ;;  %s3846_s20 = inlined_call_operand.vmem [shape: bf16[32,32], index: 20, kind: input, shape index: {}]   ;;  %s3847_s21 = inlined_call_operand.vmem [shape: f32[1,32], index: 21, kind: input, shape index: {}]   ;;  %s3848_s22 = inlined_call_operand.vmem [shape: bf16[32,128], index: 22, kind: input, shape index: {}]   ;;  %s3849_s23 = inlined_call_operand.vmem [shape: f32[1,128], index: 23, kind: input, shape index: {}]   ;;  %s3850_s24 = inlined_call_operand.hbm [shape: f32[2,128], index: 24, kind: output, shape index: {}]  }
   0x1   :  { %3858 = sst [smem:[#allocation5_spill]] %s3826_s0 }
   0x2   :  { %3859 = sst [smem:[#allocation6_spill]] %s3827_s1 }
   0x3   :  { %3860 = sst [smem:[#allocation7_spill]] %s3828_s2 }
   0x4   :  { %3861 = sst [smem:[#allocation8_spill]] %s3829_s3 }
   0x5   :  { %3862 = sst [smem:[#allocation9_spill]] %s3830_s4 }
   0x6   :  { %3863 = sst [smem:[#allocation10_spill]] %s3831_s5 }
   0x7   :  { %3864 = sst [smem:[#allocation11_spill]] %s3832_s6 }
   0x8   :  { %3865 = sst [smem:[#allocation12_spill]] %s3833_s7 }
   0x9   :  { %3866 = sst [smem:[#allocation13_spill]] %s3834_s8 }
   0xa   :  { %3867 = sst [smem:[#allocation14_spill]] %s3845_s19 }
   0xb   :  { %s3868_s27 = sld [smem:[#allocation5_spill]]  ;;  %s3869_s19 = sld [smem:[#allocation6_spill]]  ;;  %v3241_v2 = vmov 0   ;;  %v3242_v14 = vmov 0.0   ;;  %vm158_vm0 = vcmask 1043456  }
   0xc   :  { %3129 = vset.pattern.permute.xlu0 %v3241_v2  ;;  %3130 = vset.pattern.permute.xlu1 %v3241_v2  ;;  %s3870_s0 = sld [smem:[#allocation8_spill]] }
   0xd   :  { %2920 = vmatprep.subr.bf16.mxu1 %v3242_v14 }
  0x11   :  { %v79_v0 = vld [vmem:[%s3868_s27] sm:$0xff]  ;;  %v80_v9 = vld [vmem:[%s3868_s27 + $0x8] sm:$0xff] }
  0x12   :  { %v109_v1 = vld [vmem:[%s3869_s19] sm:$0xff]  ;;  %v96_v5 = vld [vmem:[%s3870_s0 + $0x8] sm:$0xff]  ;;  %v97_v6 = vld [vmem:[%s3870_s0 + $0x10] sm:$0xff]  ;;  %84 = vperm.xlu0 %3129, %v79_v0  }
  0x13   :  { %v111_v3 = vcvt.s32.f32 %v109_v1  ;;  %v95_v4 = vld [vmem:[%s3870_s0] sm:$0xff]  ;;  %v98_v8 = vld [vmem:[%s3870_s0 + $0x18] sm:$0xff]  ;;  %v100_v13 = vld [vmem:[%s3870_s0 + $0x28] sm:$0xff] }
  0x14   :  { %v3096_v7 = vpack.c.bf16 %v96_v5, %v95_v4  ;;  %v3100_v11 = vpack.c.bf16 %v98_v8, %v97_v6  ;;  %v99_v12 = vld [vmem:[%s3870_s0 + $0x20] sm:$0xff]  ;;  %v101_v15 = vld [vmem:[%s3870_s0 + $0x30] sm:$0xff]  ;;  %v102_v16 = vld [vmem:[%s3870_s0 + $0x38] sm:$0xff] }
  0x15   :  { %v114_v10 = vsub.f32 1.0, %v111_v3  ;;  %v3104_v17 = vpack.c.bf16 %v100_v13, %v99_v12  ;;  %v103_v18 = vld [vmem:[%s3870_s0 + $0x40] sm:$0xff]  ;;  %v104_v19 = vld [vmem:[%s3870_s0 + $0x48] sm:$0xff]  ;;  %v3108_v20 = vpack.c.bf16 %v102_v16, %v101_v15  ;;  %v105_v22 = vld [vmem:[%s3870_s0 + $0x50] sm:$0xff] }
  0x16   :  { %3097 = vmatprep.subr.bf16.mxu0 %v3096_v7  ;;  %87 = vperm.xlu0 %3129, %v80_v9   ;;  %v110_v21 = vld [vmem:[%s3869_s19 + $0x8] sm:$0xff]  ;;  %v3112_v24 = vpack.c.bf16 %v104_v19, %v103_v18  ;;  %v106_v25 = vld [vmem:[%s3870_s0 + $0x58] sm:$0xff]  ;;  %v107_v28 = vld [vmem:[%s3870_s0 + $0x60] sm:$0xf] }
  0x17   :  { %122 = vperm.xlu1 %3130, %v114_v10   ;;  %3099 = vmatpush3.bf16.msra.mxu0 %v3096_v7  ;;  %v112_v23 = vcvt.s32.f32 %v110_v21  ;;  %v3116_v27 = vpack.c.bf16 %v106_v25, %v105_v22 }
  0x18   :  { %3101 = vmatprep.subr.bf16.mxu0 %v3100_v11 }
  0x19   :  { %v115_v26 = vsub.f32 1.0, %v112_v23 }
  0x1a   :  { %139 = vperm.xlu0 %3129, %v111_v3  }
  0x1b   :  { %3103 = vmatpush3.bf16.msra.mxu0 %v3100_v11  ;;  %127 = vperm.xlu1 %3130, %v115_v26  }
  0x1c   :  { %3105 = vmatprep.subr.bf16.mxu0 %v3104_v17 }
  0x1f   :  { %3107 = vmatpush3.bf16.msra.mxu0 %v3104_v17  ;;  %144 = vperm.xlu1 %3130, %v112_v23  }
  0x20   :  { %3109 = vmatprep.subr.bf16.mxu0 %v3108_v20 }
  0x23   :  { %3111 = vmatpush3.bf16.msra.mxu0 %v3108_v20 }
  0x24   :  { %3113 = vmatprep.subr.bf16.mxu0 %v3112_v24 }
  0x27   :  { %3115 = vmatpush3.bf16.msra.mxu0 %v3112_v24 }
  0x28   :  { %3117 = vmatprep.subr.bf16.mxu0 %v3116_v27 }
  0x29   :  { %29 = vsyncpa [#allocation3], 0  ;;  %v81_v29 = vlaneseq  ;;  %vm151_vm1 = vcmask 818176   ;;  %s3871_s27 = sld [smem:[#allocation10_spill]]  ;;  %s3872_s4 = sld [smem:[#allocation9_spill]]  ;;  %vm241_vm4 = vcmask 261120  }
  0x2a   :  { %s3873_s26 = sld [smem:[#allocation13_spill]]  ;;  %vm3243_vm5 = vmmov 0   ;;  %s3874_s29 = sld [smem:[#allocation11_spill]]  ;;  %v2702_v22 = vld [vmem:[%s3835_s9] ss:$0 sm:$0xff]  ;;  %vm383_vm6 = vcmask 130048  }
  0x2b   :  { %3119 = vmatpush3.bf16.msra.mxu0 %v3116_v27  ;;  %v82_v30 = vand.u32 127, %v81_v29  ;;  %2924 = vmatprep.mubr.msk.bf16.mxu1 %vm3243_vm5, %v3242_v14  ;;  %s3244_s25 = smov 96   ;;  %s3876_s1 = sld [smem:[#allocation7_spill]]  ;;  %vm537_vm7 = vcmask 64512   ;;  %vm1326_vm8 = vcmask 523264   ;;  %vm2541_vm9 = vcmask 1040384  }
  0x2c   :  { %2915 = vmatprep.subr.msk.mxu0 %vm158_vm0, %v107_v28  ;;  %s3245_s6 = smov 64   ;;  %s3246_s2 = smov 80  }
  0x2d   :  { %s3247_s19 = smov 112   ;;  %s3248_s7 = smov 48  }
  0x2e   :  { %s3877_s30 = sld [smem:[#allocation14_spill]] }
  0x2f   :  { %2916 = vmatpush3.msk.msra.mxu0 %vm158_vm0, %v107_v28  ;;  %v2695_v38 = vld [vmem:[%s3871_s27] ss:$0 sm:$0xff]  ;;  %v2696_v39 = vld [vmem:[%s3871_s27 + $0x1] ss:$0 sm:$0xff]  ;;  %s3875_s27 = sld [smem:[#allocation12_spill]] }
  0x30   :  { %2948 = vmatprep.subr.bf16.mxu0 %v3242_v14  ;;  %v108_v45 = vld [vmem:[%s3872_s4] sm:$0xff]  ;;  %v3132_v3 = vld [vmem:[%s3873_s26 + $0x8] sm:$0xff]  }
  0x31   :  { %v3131_v2 = vld [vmem:[%s3873_s26] sm:$0xff]  }
  0x32   :  { %2921 = vmatpush3.bf16.msra.mxu1 %v3131_v2  ;;  %v2700_v12 = vld [vmem:[%s3874_s29] ss:$0 sm:$0xff] }
  0x33   :  { %2922 = vmatprep.subr.bf16.mxu1 %v3242_v14 }
  0x35   :  { %v2701_v17 = vld [vmem:[%s3875_s27] ss:$0 sm:$0xff] }
  0x36   :  { %2923 = vmatpush3.bf16.msra.mxu1 %v3132_v3 }
  0x37   :  { %2928 = vmatprep.subr.mxu1 %v3242_v14 }
  0x91   :  { %v85_v31 = vpop.permute.xlu0 %84 }
  0x92   :  { %vm89_vm2 = vcmp.eq.s32.totalorder %v85_v31, %v82_v30 }
  0x93   :  { %v2693_v32 = vsel %vm89_vm2, 1.0, %v3242_v14 }
  0x94   :  { %2917 = vmatprep.mubr.msk.f32.mxu0 %vm151_vm1, %v2693_v32 }
  0x95   :  { %v88_v33 = vpop.permute.xlu0 %87 }
  0x96   :  { %vm90_vm3 = vcmp.eq.s32.totalorder %v88_v33, %v82_v30  ;;  %v123_v35 = vpop.permute.xlu1 %122 }
  0x97   :  { %v2694_v34 = vsel %vm90_vm3, 1.0, %v3242_v14  ;;  %v130_v43 = vmul.f32 %v2695_v38, %v123_v35 }
  0x98   :  { %2918 = vmatmul.mubr.msk.f32.vlgmr.msra.gmra.mrb[0].mxu0 %vm151_vm1, %v2694_v34  ;;  %v285_v34 = vld [vmem:[%s3876_s1] sm:$0x1] }
  0x99   :  { %v140_v40 = vpop.permute.xlu0 %139  ;;  %2950 = vmatprep.mubr.msk.bf16.mxu0 %vm3243_vm5, %v3242_v14  ;;  %v287_v35 = vcvt.s32.f32 %v285_v34 }
  0x9a   :  { %v128_v36 = vpop.permute.xlu1 %127  ;;  %v147_v44 = vmul.f32 %v2696_v39, %v140_v40 }
  0x9b   :  { %v131_v41 = vmul.f32 %v2695_v38, %v128_v36  ;;  %v286_v36 = vld [vmem:[%s3876_s1 + $0x1] sm:$0x1]  ;;  %v289_v38 = vsub.f32 1.0, %v287_v35 }
  0x9c   :  { %v149_v50 = vadd.f32 %v147_v44, %v130_v43 }
  0x9e   :  { %v145_v37 = vpop.permute.xlu1 %144 }
  0x9f   :  { %v148_v42 = vmul.f32 %v2696_v39, %v145_v37  ;;  %v371_v37 = vshrl.u32 %v81_v29, 7  ;;  %v288_v39 = vcvt.s32.f32 %v286_v36 }
  0xa1   :  { %v150_v47 = vadd.f32 %v148_v42, %v131_v41  ;;  %v372_v40 = vsub.s32 0, %v371_v37  ;;  %v291_v41 = vmul.f32 -1e+09, %v289_v38  ;;  %v290_v42 = vsub.f32 1.0, %v288_v39 }
  0xa3   :  { %v3501_v43 = vrot.slane %v291_v41, %v372_v40  ;;  %v292_v44 = vmul.f32 -1e+09, %v290_v42 }
 0x16b   :  { %v2919_v46 = vpop.f32.mrb[0].mxu0 }
 0x16c   :  { %v234_v48 = vadd.f32 %v2919_v46, %v108_v45  ;;  %v228_v49 = vpop.f32.mrb[1].mxu0 }
 0x16d   :  { %v229_v51 = vadd.f32 %v228_v49, %v108_v45 }
 0x16e   :  { %v238_v52 = vadd.f32 %v234_v48, %v150_v47  ;;  %v3504_v48 = vrot.slane %v292_v44, %v372_v40 }
 0x16f   :  { %v237_v53 = vadd.f32 %v229_v51, %v149_v50 }
 0x170   :  { %v245_v54 = vsel %vm241_vm4, %v238_v52, 0.0 }
 0x171   :  { %246 = vadd.xlane.f32.xlu1 %v245_v54  ;;  %v242_v55 = vsel %vm241_vm4, %v237_v53, 0.0 }
 0x172   :  { %243 = vadd.xlane.f32.xlu0 %v242_v55 }
 0x1fe   :  { %v247_v56 = vpop.xlane.xlu1 %246 }
 0x1ff   :  { %v250_v57 = vmul.f32 0.03125, %v247_v56  ;;  %v244_v58 = vpop.xlane.xlu0 %243 }
 0x200   :  { %v249_v59 = vmul.f32 0.03125, %v244_v58 }
 0x201   :  { %v252_v60 = vsub.f32 %v238_v52, %v250_v57 }
 0x202   :  { %v251_v61 = vsub.f32 %v237_v53, %v249_v59 }
 0x203   :  { %v254_v0 = vmul.f32 %v252_v60, %v252_v60 }
 0x204   :  { %v253_v62 = vmul.f32 %v251_v61, %v251_v61 }
 0x205   :  { %v258_v1 = vsel %vm241_vm4, %v254_v0, 0.0 }
 0x206   :  { %v255_v63 = vsel %vm241_vm4, %v253_v62, 0.0 }
 0x207   :  { %256 = vadd.xlane.f32.xlu0 %v255_v63 }
 0x20b   :  { %259 = vadd.xlane.f32.xlu0 %v258_v1 }
 0x294   :  { %v257_v4 = vpop.xlane.xlu0 %256 }
 0x295   :  { %v261_v5 = vmul.f32 0.03125, %v257_v4 }
 0x297   :  { %v263_v6 = vadd.f32 1e-12, %v261_v5 }
 0x298   :  { %v260_v7 = vpop.xlane.xlu0 %259 }
 0x299   :  { %3155 = vrsqrt.f32 %v263_v6  ;;  %v262_v8 = vmul.f32 0.03125, %v260_v7 }
 0x29b   :  { %v264_v9 = vadd.f32 1e-12, %v262_v8 }
 0x29d   :  { %3157 = vrsqrt.f32 %v264_v9 }
 0x2a3   :  { %v3156_v10 = vpop.eup %3155 }
 0x2a4   :  { %v267_v11 = vmul.f32 %v3156_v10, %v251_v61 }
 0x2a6   :  { %v275_v16 = vmul.f32 %v2700_v12, %v267_v11  ;;  %v3133_v11 = vld [vmem:[%s3836_s10] sm:$0xff]  }
 0x2a7   :  { %v3158_v13 = vpop.eup %3157  ;;  %2949 = vmatpush3.bf16.msra.mxu0 %v3133_v11 }
 0x2a8   :  { %v268_v15 = vmul.f32 %v3158_v13, %v252_v60  ;;  %v3462_v19 = vadd.f32 %v2701_v17, %v275_v16  ;;  %2974 = vmatprep.subr.bf16.mxu0 %v3242_v14 }
 0x2aa   :  { %v276_v18 = vmul.f32 %v2700_v12, %v268_v15 }
 0x2ac   :  { %v3464_v20 = vadd.f32 %v2701_v17, %v276_v18 }
 0x2ae   :  { %v301_v21 = vpack.c.bf16 %v3464_v20, %v3462_v19 }
 0x2b0   :  { %2925 = vmatmul.mubr.msk.bf16.vlgmr.msra.gmra.mrb[0].mxu1 %vm241_vm4, %v301_v21 }
 0x2b1   :  { %2930 = vmatprep.mubr.msk.f32.mxu1 %vm3243_vm5, %v3242_v14 }
 0x383   :  { %v358_v23 = vpop.f32.mrb[0].mxu1 }
 0x384   :  { %v3474_v24 = vadd.f32 %v2702_v22, %v358_v23  ;;  %v2926_v25 = vpop.f32.mrb[1].mxu1 }
 0x385   :  { %v361_v26 = vpop.f32.mrb[2].mxu1 }
 0x386   :  { %v3476_v27 = vadd.f32 %v2702_v22, %v361_v26  ;;  %381 = vrot.lane.b32.xlu1 %v3474_v24, %s3244_s25  ;;  %v2927_v28 = vpop.f32.mrb[3].mxu1  ;;  %v366_v31 = vmul.f32 0.25, %v3474_v24 }
 0x388   :  { %460 = vrot.lane.b32.xlu0 %v3476_v27, %s3244_s25  ;;  %v367_v33 = vmul.f32 0.25, %v3476_v27 }
 0x3f8   :  { %v382_v30 = vpop.permute.xlu1 %381 }
 0x3f9   :  { %2929 = vmatpush3.xpose.msk.msra.mxu1 %vm383_vm6, %v382_v30 }
 0x3fa   :  { %2933 = vmatprep.subr.mxu1 %v3242_v14  ;;  %v461_v32 = vpop.permute.xlu0 %460 }
 0x3fc   :  { %2931 = vmatmul.mubr.msk.f32.vlgmr.msra.gmra.mrb[4].mxu1 %vm383_vm6, %v366_v31 }
 0x3fd   :  { %2934 = vmatpush3.xpose.msk.msra.mxu1 %vm383_vm6, %v461_v32  ;;  %2935 = vmatprep.mubr.msk.f32.mxu1 %vm3243_vm5, %v3242_v14 }
 0x3fe   :  { %2938 = vmatprep.subr.mxu1 %v3242_v14 }
 0x400   :  { %2936 = vmatmul.mubr.msk.f32.vlgmr.msra.gmra.mrb[6].mxu1 %vm383_vm6, %v367_v33 }
 0x401   :  { %2940 = vmatprep.mubr.msk.f32.mxu1 %vm3243_vm5, %v3242_v14 }
 0x4cf   :  { %v455_v45 = vpop.f32.mrb[4].mxu1 }
 0x4d0   :  { %v456_v46 = vadd.f32 %v455_v45, %v3501_v43  ;;  %v2932_v47 = vpop.f32.mrb[5].mxu1 }
 0x4d2   :  { %v538_v49 = vsel %vm537_vm7, %v456_v46, -inf }
 0x4d3   :  { %539 = vmax.xlane.f32.xlu1 %v538_v49  ;;  %v533_v50 = vpop.f32.mrb[6].mxu1 }
 0x4d4   :  { %v534_v29 = vadd.f32 %v533_v50, %v3504_v48  ;;  %v2937_v51 = vpop.f32.mrb[7].mxu1 }
 0x4d6   :  { %v541_v52 = vsel %vm537_vm7, %v534_v29, -inf }
 0x4d7   :  { %542 = vmax.xlane.f32.xlu0 %v541_v52 }
 0x4e4   :  { %560 = vrot.lane.b32.xlu1 %v3474_v24, %s3245_s6 }
 0x560   :  { %v540_v53 = vpop.xlane.xlu1 %539 }
 0x561   :  { %v544_v54 = vsub.f32 %v456_v46, %v540_v53 }
 0x563   :  { %v546_v55 = vmul.f32 1.442695, %v544_v54 }
 0x564   :  { %v561_v56 = vpop.permute.xlu1 %560  ;;  %v543_v57 = vpop.xlane.xlu0 %542 }
 0x565   :  { %3159 = vpow2.f32 %v546_v55  ;;  %v545_v58 = vsub.f32 %v534_v29, %v543_v57  ;;  %2939 = vmatpush3.msra.mxu1 %v561_v56 }
 0x566   :  { %2943 = vmatprep.subr.mxu1 %v3242_v14 }
 0x567   :  { %v548_v59 = vmul.f32 1.442695, %v545_v58  ;;  %v2714_v58 = vld [vmem:[%s3837_s11] ss:$0 sm:$0xff] }
 0x569   :  { %3161 = vpow2.f32 %v548_v59 }
 0x56f   :  { %v3160_v60 = vpop.eup %3159 }
 0x570   :  { %v550_v61 = vsel %vm537_vm7, %v3160_v60, 0.0 }
 0x571   :  { %551 = vadd.xlane.f32.xlu1 %v550_v61 }
 0x573   :  { %v3162_v62 = vpop.eup %3161 }
 0x574   :  { %v553_v63 = vsel %vm537_vm7, %v3162_v62, 0.0 }
 0x575   :  { %554 = vadd.xlane.f32.xlu0 %v553_v63 }
 0x582   :  { %773 = vrot.lane.b32.xlu1 %v3474_v24, %s3246_s2 }
 0x586   :  { %771 = vrot.lane.b32.xlu1 %v366_v31, %s3247_s19 }
 0x58a   :  { %849 = vrot.lane.b32.xlu1 %v367_v33, %s3247_s19 }
 0x58b   :  { %636 = vrot.lane.b32.xlu0 %v3476_v27, %s3245_s6 }
 0x58f   :  { %851 = vrot.lane.b32.xlu0 %v3476_v27, %s3246_s2 }
 0x5fe   :  { %v552_v0 = vpop.xlane.xlu1 %551 }
 0x5ff   :  { %3163 = vrcp.f32 %v552_v0 }
 0x602   :  { %v555_v1 = vpop.xlane.xlu0 %554  ;;  %v774_v6 = vpop.permute.xlu1 %773 }
 0x603   :  { %3165 = vrcp.f32 %v555_v1 }
 0x606   :  { %v637_v4 = vpop.permute.xlu0 %636  ;;  %v772_v8 = vpop.permute.xlu1 %771 }
 0x609   :  { %v3164_v2 = vpop.eup %3163 }
 0x60a   :  { %v558_v3 = vmul.f32 %v3164_v2, %v3160_v60  ;;  %v852_v9 = vpop.permute.xlu0 %851  ;;  %v850_v10 = vpop.permute.xlu1 %849 }
 0x60c   :  { %2941 = vmatmul.mubr.msk.f32.vlgmr.msra.gmra.mrb[8].mxu1 %vm537_vm7, %v558_v3 }
 0x60d   :  { %v3166_v5 = vpop.eup %3165  ;;  %2944 = vmatpush3.msra.mxu1 %v637_v4  ;;  %2945 = vmatprep.mubr.msk.f32.mxu1 %vm3243_vm5, %v3242_v14 }
 0x60e   :  { %v559_v7 = vmul.f32 %v3166_v5, %v3162_v62  ;;  %2954 = vmatprep.subr.mxu1 %v3242_v14 }
 0x610   :  { %2946 = vmatmul.mubr.msk.f32.vlgmr.msra.gmra.mrb[10].mxu1 %vm537_vm7, %v559_v7 }
 0x611   :  { %2956 = vmatprep.mubr.msk.f32.mxu1 %vm3243_vm5, %v3242_v14 }
 0x614   :  { %2955 = vmatpush3.xpose.msk.msra.mxu1 %vm383_vm6, %v774_v6 }
 0x615   :  { %2959 = vmatprep.subr.mxu1 %v3242_v14 }
 0x617   :  { %2957 = vmatmul.mubr.msk.f32.vlgmr.msra.gmra.mrb[12].mxu1 %vm383_vm6, %v772_v8 }
 0x618   :  { %2960 = vmatpush3.xpose.msk.msra.mxu1 %vm383_vm6, %v852_v9  ;;  %2961 = vmatprep.mubr.msk.f32.mxu1 %vm3243_vm5, %v3242_v14 }
 0x619   :  { %2964 = vmatprep.subr.mxu1 %v3242_v14 }
 0x61b   :  { %2962 = vmatmul.mubr.msk.f32.vlgmr.msra.gmra.mrb[14].mxu1 %vm383_vm6, %v850_v10 }
 0x61c   :  { %2966 = vmatprep.mubr.msk.f32.mxu1 %vm3243_vm5, %v3242_v14 }
 0x6df   :  { %v632_v12 = vpop.f32.mrb[8].mxu1 }
 0x6e0   :  { %v2942_v13 = vpop.f32.mrb[9].mxu1 }
 0x6e3   :  { %v708_v15 = vpop.f32.mrb[10].mxu1 }
 0x6e4   :  { %v712_v16 = vpack.c.bf16 %v708_v15, %v632_v12  ;;  %v2947_v17 = vpop.f32.mrb[11].mxu1 }
 0x6e5   :  { %v3136_v17 = vld [vmem:[%s3840_s14 + $0x8] sm:$0xff]  }
 0x6e6   :  { %2951 = vmatmul.mubr.msk.bf16.vlgmr.msra.gmra.mrb[4].mxu0 %vm383_vm6, %v712_v16 }
 0x6e7   :  { %2976 = vmatprep.mubr.msk.bf16.mxu0 %vm3243_vm5, %v3242_v14 }
 0x6ea   :  { %v845_v18 = vpop.f32.mrb[12].mxu1 }
 0x6eb   :  { %v846_v21 = vadd.f32 %v845_v18, %v3501_v43  ;;  %v2958_v22 = vpop.f32.mrb[13].mxu1 }
 0x6ed   :  { %v927_v23 = vsel %vm537_vm7, %v846_v21, -inf }
 0x6ee   :  { %928 = vmax.xlane.f32.xlu0 %v927_v23  ;;  %v923_v25 = vpop.f32.mrb[14].mxu1 }
 0x6ef   :  { %v924_v26 = vadd.f32 %v923_v25, %v3504_v48  ;;  %v2963_v28 = vpop.f32.mrb[15].mxu1 }
 0x6f1   :  { %v930_v30 = vsel %vm537_vm7, %v924_v26, -inf }
 0x6f2   :  { %931 = vmax.xlane.f32.xlu1 %v930_v30  ;;  %v2723_v30 = vld [vmem:[%s3838_s12] ss:$0 sm:$0xff] }
 0x703   :  { %949 = vrot.lane.b32.xlu1 %v3474_v24, %s3248_s7 }
 0x77b   :  { %v929_v31 = vpop.xlane.xlu0 %928 }
 0x77c   :  { %v933_v32 = vsub.f32 %v846_v21, %v929_v31 }
 0x77e   :  { %v935_v33 = vmul.f32 1.442695, %v933_v32 }
 0x77f   :  { %v932_v34 = vpop.xlane.xlu1 %931 }
 0x780   :  { %3167 = vpow2.f32 %v935_v33  ;;  %v934_v35 = vsub.f32 %v924_v26, %v932_v34 }
 0x782   :  { %v937_v36 = vmul.f32 1.442695, %v934_v35  ;;  %v2724_v35 = vld [vmem:[%s3839_s13] ss:$0 sm:$0xff] }
 0x783   :  { %v950_v37 = vpop.permute.xlu1 %949 }
 0x784   :  { %3169 = vpow2.f32 %v937_v36  ;;  %2965 = vmatpush3.msra.mxu1 %v950_v37 }
 0x785   :  { %2969 = vmatprep.subr.mxu1 %v3242_v14 }
 0x78a   :  { %v3168_v38 = vpop.eup %3167 }
 0x78b   :  { %v939_v39 = vsel %vm537_vm7, %v3168_v38, 0.0 }
 0x78c   :  { %940 = vadd.xlane.f32.xlu0 %v939_v39 }
 0x78e   :  { %v3170_v40 = vpop.eup %3169 }
 0x78f   :  { %v942_v41 = vsel %vm537_vm7, %v3170_v40, 0.0 }
 0x790   :  { %943 = vadd.xlane.f32.xlu0 %v942_v41  ;;  %v3138_v41 = vld [vmem:[%s3842_s16 + $0x8] sm:$0xff]  }
 0x7a6   :  { %1025 = vrot.lane.b32.xlu0 %v3476_v27, %s3248_s7  ;;  %v3134_v27 = vld [vmem:[%s3836_s10 + $0x8] sm:$0xff]  }
 0x7a7   :  { %2975 = vmatpush3.bf16.msra.mxu0 %v3134_v27 }
 0x7a8   :  { %2988 = vmatprep.subr.bf16.mxu0 %v3242_v14 }
 0x7b9   :  { %v756_v24 = vpop.f32.mrb[4].mxu0 }
 0x7ba   :  { %v2952_v42 = vpop.f32.mrb[5].mxu0  ;;  %v769_v59 = vadd.f32 %v2714_v58, %v756_v24  ;;  %v3139_v24 = vld [vmem:[%s3842_s16 + $0x10] sm:$0xff]  }
 0x7bb   :  { %v759_v44 = vpop.f32.mrb[6].mxu0  ;;  %v3140_v42 = vld [vmem:[%s3842_s16 + $0x18] sm:$0xff]  }
 0x7bc   :  { %v2953_v45 = vpop.f32.mrb[7].mxu0  ;;  %v770_v61 = vadd.f32 %v2714_v58, %v759_v44  ;;  %v2725_v44 = vld [vmem:[%s3841_s15] ss:$0 sm:$0xff] }
 0x819   :  { %v941_v46 = vpop.xlane.xlu0 %940 }
 0x81a   :  { %3171 = vrcp.f32 %v941_v46 }
 0x81d   :  { %v944_v47 = vpop.xlane.xlu0 %943 }
 0x81e   :  { %3173 = vrcp.f32 %v944_v47 }
 0x821   :  { %v1026_v29 = vpop.permute.xlu0 %1025 }
 0x824   :  { %v3172_v49 = vpop.eup %3171 }
 0x825   :  { %v947_v50 = vmul.f32 %v3172_v49, %v3168_v38 }
 0x827   :  { %2967 = vmatmul.mubr.msk.f32.vlgmr.msra.gmra.mrb[16].mxu1 %vm537_vm7, %v947_v50 }
 0x828   :  { %v3174_v51 = vpop.eup %3173  ;;  %2970 = vmatpush3.msra.mxu1 %v1026_v29  ;;  %2971 = vmatprep.mubr.msk.f32.mxu1 %vm3243_vm5, %v3242_v14 }
 0x829   :  { %v948_v52 = vmul.f32 %v3174_v51, %v3170_v40  ;;  %2980 = vmatprep.subr.bf16.mxu1 %v3242_v14  ;;  %v3137_v40 = vld [vmem:[%s3842_s16] sm:$0xff]  }
 0x82b   :  { %2972 = vmatmul.mubr.msk.f32.vlgmr.msra.gmra.mrb[18].mxu1 %vm537_vm7, %v948_v52 }
 0x82c   :  { %2984 = vmatprep.mubr.msk.bf16.mxu1 %vm3243_vm5, %v3242_v14 }
 0x8fa   :  { %v1021_v53 = vpop.f32.mrb[16].mxu1 }
 0x8fb   :  { %v2968_v54 = vpop.f32.mrb[17].mxu1 }
 0x8fe   :  { %v1097_v55 = vpop.f32.mrb[18].mxu1 }
 0x8ff   :  { %v1101_v56 = vpack.c.bf16 %v1097_v55, %v1021_v53  ;;  %v2973_v57 = vpop.f32.mrb[19].mxu1 }
 0x901   :  { %2977 = vmatmul.mubr.msk.bf16.vlgmr.msra.gmra.mrb[8].mxu0 %vm383_vm6, %v1101_v56 }
 0x902   :  { %2996 = vmatprep.mubr.msk.bf16.mxu0 %vm3243_vm5, %v3242_v14  ;;  %2989 = vmatpush3.bf16.msra.mxu0 %v3137_v40 }
 0x903   :  { %2990 = vmatprep.subr.bf16.mxu0 %v3242_v14 }
 0x906   :  { %2991 = vmatpush3.bf16.msra.mxu0 %v3138_v41 }
 0x907   :  { %2992 = vmatprep.subr.bf16.mxu0 %v3242_v14 }
 0x90a   :  { %2993 = vmatpush3.bf16.msra.mxu0 %v3139_v24 }
 0x90b   :  { %2994 = vmatprep.subr.bf16.mxu0 %v3242_v14 }
 0x90e   :  { %2995 = vmatpush3.bf16.msra.mxu0 %v3140_v42 }
 0x90f   :  { %3013 = vmatprep.subr.mxu0 %v3242_v14 }
 0x9d4   :  { %v1145_v60 = vpop.f32.mrb[8].mxu0 }
 0x9d5   :  { %v1152_v62 = vadd.f32 %v1145_v60, %v769_v59  ;;  %v2978_v63 = vpop.f32.mrb[9].mxu0 }
 0x9d6   :  { %v1148_v0 = vpop.f32.mrb[10].mxu0 }
 0x9d7   :  { %v1153_v1 = vadd.f32 %v1148_v0, %v770_v61  ;;  %v2979_v2 = vpop.f32.mrb[11].mxu0  ;;  %v1154_v3 = vadd.f32 %v1152_v62, %v3462_v19 }
 0x9d9   :  { %v1158_v4 = vsel %vm241_vm4, %v1154_v3, 0.0  ;;  %v1155_v5 = vadd.f32 %v1153_v1, %v3464_v20  ;;  %v3135_v20 = vld [vmem:[%s3840_s14] sm:$0xff]  }
 0x9da   :  { %1159 = vadd.xlane.f32.xlu1 %v1158_v4  ;;  %2981 = vmatpush3.bf16.msra.mxu1 %v3135_v20 }
 0x9db   :  { %v1161_v6 = vsel %vm241_vm4, %v1155_v5, 0.0  ;;  %2982 = vmatprep.subr.bf16.mxu1 %v3242_v14 }
 0x9dc   :  { %1162 = vadd.xlane.f32.xlu0 %v1161_v6 }
 0x9de   :  { %2983 = vmatpush3.bf16.msra.mxu1 %v3136_v17 }
 0x9df   :  { %3000 = vmatprep.subr.bf16.mxu1 %v3242_v14 }
 0xa67   :  { %v1160_v7 = vpop.xlane.xlu1 %1159 }
 0xa68   :  { %v1164_v8 = vmul.f32 0.03125, %v1160_v7 }
 0xa69   :  { %v1163_v9 = vpop.xlane.xlu0 %1162 }
 0xa6a   :  { %v1166_v10 = vsub.f32 %v1154_v3, %v1164_v8  ;;  %v1165_v11 = vmul.f32 0.03125, %v1163_v9 }
 0xa6c   :  { %v1167_v12 = vsub.f32 %v1155_v5, %v1165_v11  ;;  %v1168_v13 = vmul.f32 %v1166_v10, %v1166_v10  ;;  %v2729_v5 = vld [vmem:[%s3843_s17] ss:$0 sm:$0xff] }
 0xa6e   :  { %v1170_v15 = vsel %vm241_vm4, %v1168_v13, 0.0  ;;  %v1169_v16 = vmul.f32 %v1167_v12, %v1167_v12 }
 0xa6f   :  { %1171 = vadd.xlane.f32.xlu1 %v1170_v15 }
 0xa70   :  { %v1173_v19 = vsel %vm241_vm4, %v1169_v16, 0.0 }
 0xa71   :  { %1174 = vadd.xlane.f32.xlu0 %v1173_v19 }
 0xafc   :  { %v1172_v18 = vpop.xlane.xlu1 %1171 }
 0xafd   :  { %v1176_v21 = vmul.f32 0.03125, %v1172_v18 }
 0xafe   :  { %v1175_v22 = vpop.xlane.xlu0 %1174 }
 0xaff   :  { %v1178_v23 = vadd.f32 1e-12, %v1176_v21  ;;  %v1177_v25 = vmul.f32 0.03125, %v1175_v22 }
 0xb01   :  { %3175 = vrsqrt.f32 %v1178_v23  ;;  %v1179_v26 = vadd.f32 1e-12, %v1177_v25 }
 0xb03   :  { %3177 = vrsqrt.f32 %v1179_v26 }
 0xb0b   :  { %v3176_v28 = vpop.eup %3175 }
 0xb0c   :  { %v1182_v31 = vmul.f32 %v3176_v28, %v1166_v10 }
 0xb0d   :  { %v3178_v32 = vpop.eup %3177 }
 0xb0e   :  { %v1190_v33 = vmul.f32 %v2723_v30, %v1182_v31  ;;  %v1183_v34 = vmul.f32 %v3178_v32, %v1167_v12  ;;  %v3142_v31 = vld [vmem:[%s3873_s26 + $0x18] sm:$0xff]  }
 0xb10   :  { %v1191_v36 = vmul.f32 %v2723_v30, %v1183_v34  ;;  %v1198_v37 = vadd.f32 %v2724_v35, %v1190_v33  ;;  %v3141_v30 = vld [vmem:[%s3873_s26 + $0x10] sm:$0xff]  }
 0xb12   :  { %v1199_v38 = vadd.f32 %v2724_v35, %v1191_v36 }
 0xb14   :  { %v1200_v39 = vpack.c.bf16 %v1199_v38, %v1198_v37 }
 0xb16   :  { %2985 = vmatmul.mubr.msk.bf16.vlgmr.msra.gmra.mrb[20].mxu1 %vm241_vm4, %v1200_v39  ;;  %v2735_v39 = vld [vmem:[%s3844_s18] ss:$0 sm:$0xff] }
 0xb17   :  { %3004 = vmatprep.mubr.msk.bf16.mxu1 %vm3243_vm5, %v3242_v14  ;;  %3001 = vmatpush3.bf16.msra.mxu1 %v3141_v30  ;;  %v3143_v30 = vld [vmem:[%s3836_s10 + $0x10] sm:$0xff]  }
 0xb18   :  { %3002 = vmatprep.subr.bf16.mxu1 %v3242_v14 }
 0xb1b   :  { %3003 = vmatpush3.bf16.msra.mxu1 %v3142_v31 }
 0xb1c   :  { %3008 = vmatprep.subr.mxu1 %v3242_v14 }
 0xbe9   :  { %v1261_v45 = vpop.f32.mrb[20].mxu1 }
 0xbea   :  { %v1262_v46 = vadd.f32 %v2725_v44, %v1261_v45  ;;  %v2986_v47 = vpop.f32.mrb[21].mxu1 }
 0xbeb   :  { %v1264_v49 = vpop.f32.mrb[22].mxu1 }
 0xbec   :  { %v1268_v50 = vmul.f32 %v1262_v46, %v1262_v46  ;;  %v1265_v29 = vadd.f32 %v2725_v44, %v1264_v49  ;;  %v2987_v51 = vpop.f32.mrb[23].mxu1  ;;  %v2736_v44 = vld [vmem:[%s3877_s30] ss:$0 sm:$0xff] }
 0xbee   :  { %v1270_v52 = vmul.f32 %v1268_v50, %v1262_v46  ;;  %v1269_v27 = vmul.f32 %v1265_v29, %v1265_v29  ;;  %v2746_v50 = vld [vmem:[%s3835_s9 + $0x1] ss:$0 sm:$0xff] }
 0xbf0   :  { %v1272_v53 = vmul.f32 0.044715, %v1270_v52  ;;  %v1271_v54 = vmul.f32 %v1269_v27, %v1265_v29 }
 0xbf2   :  { %v1274_v55 = vadd.f32 %v1272_v53, %v1262_v46  ;;  %v1273_v56 = vmul.f32 0.044715, %v1271_v54 }
 0xbf4   :  { %v1276_v57 = vmul.f32 0.7978846, %v1274_v55  ;;  %v1275_v58 = vadd.f32 %v1273_v56, %v1265_v29 }
 0xbf6   :  { %3179 = vtanh.f32 %v1276_v57  ;;  %v1277_v59 = vmul.f32 0.7978846, %v1275_v58 }
 0xbf8   :  { %3181 = vtanh.f32 %v1277_v59 }
 0xc00   :  { %v3180_v60 = vpop.eup %3179 }
 0xc01   :  { %v1280_v61 = vadd.f32 1.0, %v3180_v60 }
 0xc02   :  { %v3182_v62 = vpop.eup %3181 }
 0xc03   :  { %v1282_v63 = vmul.f32 0.5, %v1280_v61  ;;  %v1281_v0 = vadd.f32 1.0, %v3182_v62 }
 0xc05   :  { %v1283_v1 = vmul.f32 0.5, %v1281_v0  ;;  %v1284_v2 = vmul.f32 %v1282_v63, %v1262_v46 }
 0xc07   :  { %v1285_v3 = vmul.f32 %v1283_v1, %v1265_v29 }
 0xc09   :  { %v1286_v4 = vpack.c.bf16 %v1285_v3, %v1284_v2 }
 0xc0b   :  { %2997 = vmatmul.mubr.msk.bf16.vlgmr.msra.gmra.mrb[12].mxu0 %vm1326_vm8, %v1286_v4 }
 0xc0c   :  { %3015 = vmatprep.mubr.msk.f32.mxu0 %vm3243_vm5, %v3242_v14 }
 0xcde   :  { %v1364_v6 = vpop.f32.mrb[12].mxu0 }
 0xcdf   :  { %v1365_v7 = vadd.f32 %v2729_v5, %v1364_v6  ;;  %v2998_v8 = vpop.f32.mrb[13].mxu0 }
 0xce0   :  { %v1367_v9 = vpop.f32.mrb[14].mxu0 }
 0xce1   :  { %v1368_v10 = vadd.f32 %v2729_v5, %v1367_v9  ;;  %v2999_v11 = vpop.f32.mrb[15].mxu0  ;;  %v1371_v12 = vadd.f32 %v1365_v7, %v1198_v37 }
 0xce3   :  { %v1375_v13 = vsel %vm241_vm4, %v1371_v12, 0.0  ;;  %v1372_v15 = vadd.f32 %v1368_v10, %v1199_v38 }
 0xce4   :  { %1376 = vadd.xlane.f32.xlu1 %v1375_v13 }
 0xce5   :  { %v1378_v16 = vsel %vm241_vm4, %v1372_v15, 0.0 }
 0xce6   :  { %1379 = vadd.xlane.f32.xlu0 %v1378_v16 }
 0xd71   :  { %v1377_v19 = vpop.xlane.xlu1 %1376 }
 0xd72   :  { %v1381_v20 = vmul.f32 0.03125, %v1377_v19 }
 0xd73   :  { %v1380_v17 = vpop.xlane.xlu0 %1379 }
 0xd74   :  { %v1383_v18 = vsub.f32 %v1371_v12, %v1381_v20  ;;  %v1382_v21 = vmul.f32 0.03125, %v1380_v17 }
 0xd76   :  { %v1384_v22 = vsub.f32 %v1372_v15, %v1382_v21  ;;  %v1385_v23 = vmul.f32 %v1383_v18, %v1383_v18 }
 0xd78   :  { %v1387_v25 = vsel %vm241_vm4, %v1385_v23, 0.0  ;;  %v1386_v26 = vmul.f32 %v1384_v22, %v1384_v22 }
 0xd79   :  { %1388 = vadd.xlane.f32.xlu1 %v1387_v25 }
 0xd7a   :  { %v1390_v28 = vsel %vm241_vm4, %v1386_v26, 0.0 }
 0xd7b   :  { %1391 = vadd.xlane.f32.xlu0 %v1390_v28 }
 0xe06   :  { %v1389_v32 = vpop.xlane.xlu1 %1388 }
 0xe07   :  { %v1393_v33 = vmul.f32 0.03125, %v1389_v32 }
 0xe08   :  { %v1392_v34 = vpop.xlane.xlu0 %1391 }
 0xe09   :  { %v1395_v35 = vadd.f32 1e-12, %v1393_v33  ;;  %v1394_v36 = vmul.f32 0.03125, %v1392_v34 }
 0xe0b   :  { %3183 = vrsqrt.f32 %v1395_v35  ;;  %v1396_v37 = vadd.f32 1e-12, %v1394_v36 }
 0xe0d   :  { %3185 = vrsqrt.f32 %v1396_v37 }
 0xe15   :  { %v3184_v38 = vpop.eup %3183 }
 0xe16   :  { %v1399_v40 = vmul.f32 %v3184_v38, %v1383_v18 }
 0xe17   :  { %v3186_v41 = vpop.eup %3185 }
 0xe18   :  { %v1407_v24 = vmul.f32 %v2735_v39, %v1399_v40  ;;  %v1400_v42 = vmul.f32 %v3186_v41, %v1384_v22 }
 0xe1a   :  { %v1408_v45 = vmul.f32 %v2735_v39, %v1400_v42  ;;  %v3640_v46 = vadd.f32 %v2736_v44, %v1407_v24 }
 0xe1c   :  { %v3642_v47 = vadd.f32 %v2736_v44, %v1408_v45 }
 0xe1e   :  { %v1427_v49 = vpack.c.bf16 %v3642_v47, %v3640_v46 }
 0xe20   :  { %3005 = vmatmul.mubr.msk.bf16.vlgmr.msra.gmra.mrb[24].mxu1 %vm241_vm4, %v1427_v49 }
 0xe21   :  { %3010 = vmatprep.mubr.msk.f32.mxu1 %vm3243_vm5, %v3242_v14 }
 0xef3   :  { %v1485_v29 = vpop.f32.mrb[24].mxu1 }
 0xef4   :  { %v3652_v51 = vadd.f32 %v2746_v50, %v1485_v29  ;;  %v3006_v52 = vpop.f32.mrb[25].mxu1 }
 0xef5   :  { %v1488_v27 = vpop.f32.mrb[26].mxu1 }
 0xef6   :  { %v1489_v53 = vadd.f32 %v2746_v50, %v1488_v27  ;;  %1497 = vrot.lane.b32.xlu0 %v3652_v51, %s3244_s25  ;;  %v3007_v54 = vpop.f32.mrb[27].mxu1  ;;  %v1494_v57 = vmul.f32 0.25, %v3652_v51 }
 0xef8   :  { %1575 = vrot.lane.b32.xlu1 %v1489_v53, %s3244_s25  ;;  %v1495_v58 = vmul.f32 0.25, %v1489_v53 }
 0xf68   :  { %v1498_v55 = vpop.permute.xlu0 %1497 }
 0xf69   :  { %3009 = vmatpush3.xpose.msk.msra.mxu1 %vm383_vm6, %v1498_v55 }
 0xf6a   :  { %v1576_v56 = vpop.permute.xlu1 %1575  ;;  %3018 = vmatprep.subr.mxu1 %v3242_v14 }
 0xf6b   :  { %3014 = vmatpush3.xpose.msk.msra.mxu0 %vm383_vm6, %v1576_v56 }
 0xf6c   :  { %3011 = vmatmul.mubr.msk.f32.vlgmr.msra.gmra.mrb[28].mxu1 %vm383_vm6, %v1494_v57  ;;  %3023 = vmatprep.subr.mxu0 %v3242_v14 }
 0xf6d   :  { %3020 = vmatprep.mubr.msk.f32.mxu1 %vm3243_vm5, %v3242_v14 }
 0xf6e   :  { %3016 = vmatmul.mubr.msk.f32.vlgmr.msra.gmra.mrb[2].mxu0 %vm383_vm6, %v1495_v58 }
 0xf6f   :  { %3025 = vmatprep.mubr.msk.f32.mxu0 %vm3243_vm5, %v3242_v14 }
0x103f   :  { %v1570_v59 = vpop.f32.mrb[28].mxu1 }
0x1040   :  { %v3012_v60 = vpop.f32.mrb[29].mxu1  ;;  %v1571_v1 = vadd.f32 %v1570_v59, %v3501_v43 }
0x1041   :  { %v1648_v61 = vpop.f32.mrb[2].mxu0 }
0x1042   :  { %v1649_v62 = vadd.f32 %v1648_v61, %v3504_v48  ;;  %v3017_v63 = vpop.f32.mrb[3].mxu0  ;;  %v1652_v2 = vsel %vm537_vm7, %v1571_v1, -inf }
0x1044   :  { %v1655_v0 = vsel %vm537_vm7, %v1649_v62, -inf }
0x1045   :  { %1656 = vmax.xlane.f32.xlu1 %v1655_v0  ;;  %v3144_v0 = vld [vmem:[%s3836_s10 + $0x18] sm:$0xff]  }
0x1056   :  { %1750 = vrot.lane.b32.xlu1 %v1489_v53, %s3245_s6 }
0x105a   :  { %1885 = vrot.lane.b32.xlu1 %v1494_v57, %s3247_s19 }
0x105e   :  { %1965 = vrot.lane.b32.xlu1 %v1489_v53, %s3246_s2 }
0x1082   :  { %1653 = vmax.xlane.f32.xlu1 %v1652_v2 }
0x10d2   :  { %v1657_v3 = vpop.xlane.xlu1 %1656 }
0x10d3   :  { %v1659_v4 = vsub.f32 %v1649_v62, %v1657_v3 }
0x10d5   :  { %v1662_v5 = vmul.f32 1.442695, %v1659_v4 }
0x10d6   :  { %v1751_v6 = vpop.permute.xlu1 %1750 }
0x10d7   :  { %3187 = vpow2.f32 %v1662_v5  ;;  %3024 = vmatpush3.msra.mxu0 %v1751_v6  ;;  %v2759_v6 = vld [vmem:[%s3837_s11 + $0x1] ss:$0 sm:$0xff] }
0x10d8   :  { %3034 = vmatprep.subr.mxu0 %v3242_v14 }
0x10da   :  { %v1886_v9 = vpop.permute.xlu1 %1885 }
0x10de   :  { %v1966_v10 = vpop.permute.xlu1 %1965 }
0x10e1   :  { %v3188_v7 = vpop.eup %3187 }
0x10e2   :  { %v1667_v8 = vsel %vm537_vm7, %v3188_v7, 0.0 }
0x10e3   :  { %1668 = vadd.xlane.f32.xlu0 %v1667_v8 }
0x10f9   :  { %1887 = vrot.lane.b32.xlu0 %v3652_v51, %s3246_s2 }
0x10fd   :  { %1963 = vrot.lane.b32.xlu0 %v1495_v58, %s3247_s19 }
0x110f   :  { %v1654_v11 = vpop.xlane.xlu1 %1653 }
0x1110   :  { %v1658_v12 = vsub.f32 %v1571_v1, %v1654_v11 }
0x1112   :  { %v1660_v13 = vmul.f32 1.442695, %v1658_v12 }
0x1114   :  { %3189 = vpow2.f32 %v1660_v13 }
0x111e   :  { %v3190_v15 = vpop.eup %3189 }
0x111f   :  { %v1664_v16 = vsel %vm537_vm7, %v3190_v15, 0.0 }
0x1120   :  { %1665 = vadd.xlane.f32.xlu0 %v1664_v16 }
0x1136   :  { %1674 = vrot.lane.b32.xlu0 %v3652_v51, %s3245_s6 }
0x113a   :  { %2139 = vrot.lane.b32.xlu0 %v1489_v53, %s3248_s7 }
0x1170   :  { %v1669_v19 = vpop.xlane.xlu0 %1668 }
0x1171   :  { %3191 = vrcp.f32 %v1669_v19 }
0x1174   :  { %v1888_v18 = vpop.permute.xlu0 %1887 }
0x1178   :  { %v1964_v21 = vpop.permute.xlu0 %1963 }
0x117b   :  { %v3192_v20 = vpop.eup %3191 }
0x117c   :  { %v1673_v17 = vmul.f32 %v3192_v20, %v3188_v7 }
0x117e   :  { %3026 = vmatmul.mubr.msk.f32.vlgmr.msra.gmra.mrb[16].mxu0 %vm537_vm7, %v1673_v17 }
0x117f   :  { %3035 = vmatpush3.xpose.msk.msra.mxu0 %vm383_vm6, %v1888_v18  ;;  %3036 = vmatprep.mubr.msk.f32.mxu0 %vm3243_vm5, %v3242_v14 }
0x1180   :  { %3039 = vmatprep.subr.mxu0 %v3242_v14 }
0x1182   :  { %3037 = vmatmul.mubr.msk.f32.vlgmr.msra.gmra.mrb[18].mxu0 %vm383_vm6, %v1886_v9 }
0x1183   :  { %3040 = vmatpush3.xpose.msk.msra.mxu0 %vm383_vm6, %v1966_v10  ;;  %3041 = vmatprep.mubr.msk.f32.mxu0 %vm3243_vm5, %v3242_v14 }
0x1184   :  { %3049 = vmatprep.subr.mxu0 %v3242_v14 }
0x1186   :  { %3042 = vmatmul.mubr.msk.f32.vlgmr.msra.gmra.mrb[20].mxu0 %vm383_vm6, %v1964_v21 }
0x1187   :  { %3051 = vmatprep.mubr.msk.f32.mxu0 %vm3243_vm5, %v3242_v14 }
0x11ad   :  { %v1666_v22 = vpop.xlane.xlu0 %1665 }
0x11ae   :  { %3193 = vrcp.f32 %v1666_v22 }
0x11b1   :  { %v1675_v23 = vpop.permute.xlu0 %1674 }
0x11b2   :  { %3019 = vmatpush3.msra.mxu1 %v1675_v23 }
0x11b3   :  { %3028 = vmatprep.subr.bf16.mxu1 %v3242_v14 }
0x11b5   :  { %v2140_v25 = vpop.permute.xlu0 %2139 }
0x11b6   :  { %3050 = vmatpush3.msra.mxu0 %v2140_v25 }
0x11b7   :  { %3060 = vmatprep.subr.bf16.mxu0 %v3242_v14 }
0x11b8   :  { %v3194_v26 = vpop.eup %3193 }
0x11b9   :  { %v1672_v28 = vmul.f32 %v3194_v26, %v3190_v15 }
0x11bb   :  { %3021 = vmatmul.mubr.msk.f32.vlgmr.msra.gmra.mrb[30].mxu1 %vm537_vm7, %v1672_v28 }
0x11bc   :  { %3030 = vmatprep.mubr.msk.bf16.mxu1 %vm3243_vm5, %v3242_v14  ;;  %3029 = vmatpush3.bf16.msra.mxu1 %v3143_v30 }
0x11bd   :  { %3044 = vmatprep.subr.mxu1 %v3242_v14 }
0x1251   :  { %v1822_v31 = vpop.f32.mrb[16].mxu0 }
0x1252   :  { %v3027_v32 = vpop.f32.mrb[17].mxu0 }
0x1253   :  { %v3146_v32 = vld [vmem:[%s3840_s14 + $0x18] sm:$0xff]  }
0x1255   :  { %v1959_v33 = vpop.f32.mrb[18].mxu0 }
0x1256   :  { %v1960_v34 = vadd.f32 %v1959_v33, %v3501_v43  ;;  %v3038_v35 = vpop.f32.mrb[19].mxu0 }
0x1258   :  { %v2041_v36 = vsel %vm537_vm7, %v1960_v34, -inf }
0x1259   :  { %v2037_v37 = vpop.f32.mrb[20].mxu0  ;;  %2042 = vmax.xlane.f32.xlu1 %v2041_v36 }
0x125a   :  { %v2038_v38 = vadd.f32 %v2037_v37, %v3504_v48  ;;  %v3043_v39 = vpop.f32.mrb[21].mxu0 }
0x125c   :  { %v2044_v40 = vsel %vm537_vm7, %v2038_v38, -inf }
0x125d   :  { %2045 = vmax.xlane.f32.xlu1 %v2044_v40 }
0x128e   :  { %v1746_v41 = vpop.f32.mrb[30].mxu1 }
0x128f   :  { %v1826_v24 = vpack.c.bf16 %v1822_v31, %v1746_v41  ;;  %v3022_v42 = vpop.f32.mrb[31].mxu1  ;;  %v2770_v41 = vld [vmem:[%s3838_s12 + $0x1] ss:$0 sm:$0xff] }
0x1291   :  { %3031 = vmatmul.mubr.msk.bf16.vlgmr.msra.gmra.mrb[32].mxu1 %vm383_vm6, %v1826_v24 }
0x1292   :  { %3046 = vmatprep.mubr.msk.f32.mxu1 %vm3243_vm5, %v3242_v14 }
0x12e6   :  { %v2043_v43 = vpop.xlane.xlu1 %2042 }
0x12e7   :  { %v2047_v44 = vsub.f32 %v1960_v34, %v2043_v43 }
0x12e9   :  { %v2049_v45 = vmul.f32 1.442695, %v2047_v44  ;;  %v2771_v44 = vld [vmem:[%s3839_s13 + $0x1] ss:$0 sm:$0xff] }
0x12ea   :  { %v2046_v49 = vpop.xlane.xlu1 %2045 }
0x12eb   :  { %3195 = vpow2.f32 %v2049_v45  ;;  %v2048_v50 = vsub.f32 %v2038_v38, %v2046_v49 }
0x12ed   :  { %v2051_v29 = vmul.f32 1.442695, %v2048_v50 }
0x12ef   :  { %3197 = vpow2.f32 %v2051_v29 }
0x12f5   :  { %v3196_v48 = vpop.eup %3195 }
0x12f6   :  { %v2053_v52 = vsel %vm537_vm7, %v3196_v48, 0.0 }
0x12f7   :  { %2054 = vadd.xlane.f32.xlu1 %v2053_v52  ;;  %v3148_v52 = vld [vmem:[%s3842_s16 + $0x28] sm:$0xff]  }
0x12f9   :  { %v3198_v27 = vpop.eup %3197 }
0x12fa   :  { %v2056_v53 = vsel %vm537_vm7, %v3198_v27, 0.0 }
0x12fb   :  { %2057 = vadd.xlane.f32.xlu1 %v2056_v53  ;;  %v3150_v53 = vld [vmem:[%s3842_s16 + $0x38] sm:$0xff]  }
0x130c   :  { %2063 = vrot.lane.b32.xlu1 %v3652_v51, %s3248_s7 }
0x1364   :  { %v1870_v54 = vpop.f32.mrb[32].mxu1 }
0x1365   :  { %v3032_v55 = vpop.f32.mrb[33].mxu1  ;;  %v1883_v7 = vadd.f32 %v2759_v6, %v1870_v54  ;;  %v2777_v54 = vld [vmem:[%s3841_s15 + $0x1] ss:$0 sm:$0xff] }
0x1366   :  { %v1873_v56 = vpop.f32.mrb[34].mxu1 }
0x1367   :  { %v3033_v57 = vpop.f32.mrb[35].mxu1  ;;  %v1884_v9 = vadd.f32 %v2759_v6, %v1873_v56 }
0x1384   :  { %v2055_v58 = vpop.xlane.xlu1 %2054 }
0x1385   :  { %3199 = vrcp.f32 %v2055_v58 }
0x1388   :  { %v2058_v59 = vpop.xlane.xlu1 %2057 }
0x1389   :  { %3201 = vrcp.f32 %v2058_v59 }
0x138c   :  { %v2064_v60 = vpop.permute.xlu1 %2063 }
0x138d   :  { %3045 = vmatpush3.msra.mxu1 %v2064_v60 }
0x138e   :  { %3054 = vmatprep.subr.bf16.mxu1 %v3242_v14 }
0x138f   :  { %v3200_v61 = vpop.eup %3199 }
0x1390   :  { %v2061_v62 = vmul.f32 %v3200_v61, %v3196_v48  ;;  %v3147_v48 = vld [vmem:[%s3842_s16 + $0x20] sm:$0xff]  }
0x1392   :  { %3047 = vmatmul.mubr.msk.f32.vlgmr.msra.gmra.mrb[36].mxu1 %vm537_vm7, %v2061_v62 }
0x1393   :  { %v3202_v63 = vpop.eup %3201  ;;  %3056 = vmatprep.mubr.msk.bf16.mxu1 %vm3243_vm5, %v3242_v14  ;;  %3055 = vmatpush3.bf16.msra.mxu1 %v3144_v0 }
0x1394   :  { %v2062_v51 = vmul.f32 %v3202_v63, %v3198_v27  ;;  %3068 = vmatprep.subr.bf16.mxu1 %v3242_v14  ;;  %v3149_v27 = vld [vmem:[%s3842_s16 + $0x30] sm:$0xff]  }
0x1396   :  { %3052 = vmatmul.mubr.msk.f32.vlgmr.msra.gmra.mrb[22].mxu0 %vm537_vm7, %v2062_v51 }
0x1397   :  { %3064 = vmatprep.mubr.msk.bf16.mxu0 %vm3243_vm5, %v3242_v14 }
0x1465   :  { %v2135_v1 = vpop.f32.mrb[36].mxu1 }
0x1466   :  { %v3048_v2 = vpop.f32.mrb[37].mxu1 }
0x1469   :  { %v2211_v3 = vpop.f32.mrb[22].mxu0 }
0x146a   :  { %v2215_v4 = vpack.c.bf16 %v2211_v3, %v2135_v1  ;;  %v3053_v5 = vpop.f32.mrb[23].mxu0 }
0x146c   :  { %3057 = vmatmul.mubr.msk.bf16.vlgmr.msra.gmra.mrb[40].mxu1 %vm383_vm6, %v2215_v4 }
0x146d   :  { %3076 = vmatprep.mubr.msk.bf16.mxu1 %vm3243_vm5, %v3242_v14  ;;  %3069 = vmatpush3.bf16.msra.mxu1 %v3147_v48 }
0x146e   :  { %3070 = vmatprep.subr.bf16.mxu1 %v3242_v14 }
0x1471   :  { %3071 = vmatpush3.bf16.msra.mxu1 %v3148_v52 }
0x1472   :  { %3072 = vmatprep.subr.bf16.mxu1 %v3242_v14 }
0x1475   :  { %3073 = vmatpush3.bf16.msra.mxu1 %v3149_v27 }
0x1476   :  { %3074 = vmatprep.subr.bf16.mxu1 %v3242_v14 }
0x1479   :  { %3075 = vmatpush3.bf16.msra.mxu1 %v3150_v53 }
0x153f   :  { %v2259_v8 = vpop.f32.mrb[40].mxu1 }
0x1540   :  { %v2266_v10 = vadd.f32 %v2259_v8, %v1883_v7  ;;  %v3058_v11 = vpop.f32.mrb[41].mxu1 }
0x1541   :  { %v2262_v12 = vpop.f32.mrb[42].mxu1 }
0x1542   :  { %v2267_v13 = vadd.f32 %v2262_v12, %v1884_v9  ;;  %v3059_v15 = vpop.f32.mrb[43].mxu1  ;;  %v2268_v16 = vadd.f32 %v2266_v10, %v3640_v46 }
0x1544   :  { %v2274_v19 = vsel %vm241_vm4, %v2268_v16, 0.0  ;;  %v2269_v20 = vadd.f32 %v2267_v13, %v3642_v47  ;;  %v3145_v47 = vld [vmem:[%s3840_s14 + $0x10] sm:$0xff]  }
0x1545   :  { %2275 = vadd.xlane.f32.xlu0 %v2274_v19  ;;  %3061 = vmatpush3.bf16.msra.mxu0 %v3145_v47 }
0x1546   :  { %v2277_v17 = vsel %vm241_vm4, %v2269_v20, 0.0  ;;  %3062 = vmatprep.subr.bf16.mxu0 %v3242_v14 }
0x1547   :  { %2278 = vadd.xlane.f32.xlu1 %v2277_v17 }
0x1549   :  { %3063 = vmatpush3.bf16.msra.mxu0 %v3146_v32 }
0x154a   :  { %3080 = vmatprep.subr.bf16.mxu0 %v3242_v14 }
0x15d2   :  { %v2276_v18 = vpop.xlane.xlu0 %2275 }
0x15d3   :  { %v2280_v21 = vmul.f32 0.03125, %v2276_v18 }
0x15d4   :  { %v2279_v22 = vpop.xlane.xlu1 %2278 }
0x15d5   :  { %v2282_v23 = vsub.f32 %v2268_v16, %v2280_v21  ;;  %v2281_v25 = vmul.f32 0.03125, %v2279_v22  ;;  %v2790_v16 = vld [vmem:[%s3843_s17 + $0x1] ss:$0 sm:$0xff] }
0x15d7   :  { %v2283_v26 = vsub.f32 %v2269_v20, %v2281_v25  ;;  %v2284_v28 = vmul.f32 %v2282_v23, %v2282_v23 }
0x15d9   :  { %v2286_v30 = vsel %vm241_vm4, %v2284_v28, 0.0  ;;  %v2285_v31 = vmul.f32 %v2283_v26, %v2283_v26 }
0x15da   :  { %2287 = vadd.xlane.f32.xlu0 %v2286_v30 }
0x15db   :  { %v2289_v46 = vsel %vm241_vm4, %v2285_v31, 0.0 }
0x15de   :  { %2290 = vadd.xlane.f32.xlu0 %v2289_v46 }
0x1667   :  { %v2288_v33 = vpop.xlane.xlu0 %2287 }
0x1668   :  { %v2292_v34 = vmul.f32 0.03125, %v2288_v33 }
0x166a   :  { %v2294_v35 = vadd.f32 1e-12, %v2292_v34 }
0x166b   :  { %v2291_v36 = vpop.xlane.xlu0 %2290 }
0x166c   :  { %3203 = vrsqrt.f32 %v2294_v35  ;;  %v2293_v37 = vmul.f32 0.03125, %v2291_v36 }
0x166e   :  { %v2295_v38 = vadd.f32 1e-12, %v2293_v37 }
0x1670   :  { %3205 = vrsqrt.f32 %v2295_v38  ;;  %v3151_v38 = vld [vmem:[%s3846_s20] sm:$0xff]  }
0x1676   :  { %v3204_v39 = vpop.eup %3203 }
0x1677   :  { %v2298_v40 = vmul.f32 %v3204_v39, %v2282_v23  ;;  %v3152_v39 = vld [vmem:[%s3846_s20 + $0x8] sm:$0xff]  }
0x1679   :  { %v2306_v42 = vmul.f32 %v2770_v41, %v2298_v40 }
0x167a   :  { %v3206_v24 = vpop.eup %3205 }
0x167b   :  { %v2299_v43 = vmul.f32 %v3206_v24, %v2283_v26  ;;  %v2314_v49 = vadd.f32 %v2771_v44, %v2306_v42 }
0x167d   :  { %v2307_v45 = vmul.f32 %v2770_v41, %v2299_v43 }
0x167f   :  { %v2315_v50 = vadd.f32 %v2771_v44, %v2307_v45 }
0x1681   :  { %v2316_v29 = vpack.c.bf16 %v2315_v50, %v2314_v49 }
0x1683   :  { %3065 = vmatmul.mubr.msk.bf16.vlgmr.msra.gmra.mrb[24].mxu0 %vm241_vm4, %v2316_v29  ;;  %v2799_v29 = vld [vmem:[%s3877_s30 + $0x1] ss:$0 sm:$0xff] }
0x1684   :  { %3084 = vmatprep.mubr.msk.bf16.mxu0 %vm3243_vm5, %v3242_v14  ;;  %3081 = vmatpush3.bf16.msra.mxu0 %v3151_v38 }
0x1685   :  { %3082 = vmatprep.subr.bf16.mxu0 %v3242_v14 }
0x1688   :  { %3083 = vmatpush3.bf16.msra.mxu0 %v3152_v39 }
0x1689   :  { %3088 = vmatprep.subr.bf16.mxu0 %v3242_v14 }
0x1756   :  { %v2379_v55 = vpop.f32.mrb[24].mxu0 }
0x1757   :  { %v2380_v56 = vadd.f32 %v2777_v54, %v2379_v55  ;;  %v3066_v57 = vpop.f32.mrb[25].mxu0 }
0x1758   :  { %v2382_v58 = vpop.f32.mrb[26].mxu0 }
0x1759   :  { %v2386_v59 = vmul.f32 %v2380_v56, %v2380_v56  ;;  %v2383_v60 = vadd.f32 %v2777_v54, %v2382_v58  ;;  %v3067_v61 = vpop.f32.mrb[27].mxu0 }
0x175a   :  { %v2800_v61 = vld [vmem:[%s3847_s21] ss:$0 sm:$0xff] }
0x175b   :  { %v2388_v62 = vmul.f32 %v2386_v59, %v2380_v56  ;;  %v2387_v63 = vmul.f32 %v2383_v60, %v2383_v60  ;;  %v3153_v59 = vld [vmem:[%s3848_s22] sm:$0xff]  }
0x175d   :  { %v2390_v51 = vmul.f32 0.044715, %v2388_v62  ;;  %v2389_v0 = vmul.f32 %v2387_v63, %v2383_v60 }
0x175f   :  { %v2392_v1 = vadd.f32 %v2390_v51, %v2380_v56  ;;  %v2391_v2 = vmul.f32 0.044715, %v2389_v0 }
0x1761   :  { %v2394_v3 = vmul.f32 0.7978846, %v2392_v1  ;;  %v2393_v4 = vadd.f32 %v2391_v2, %v2383_v60 }
0x1763   :  { %3207 = vtanh.f32 %v2394_v3  ;;  %v2395_v5 = vmul.f32 0.7978846, %v2393_v4 }
0x1765   :  { %3209 = vtanh.f32 %v2395_v5 }
0x176d   :  { %v3208_v6 = vpop.eup %3207 }
0x176e   :  { %v2398_v7 = vadd.f32 1.0, %v3208_v6 }
0x176f   :  { %v3210_v8 = vpop.eup %3209 }
0x1770   :  { %v2400_v9 = vmul.f32 0.5, %v2398_v7  ;;  %v2399_v10 = vadd.f32 1.0, %v3210_v8 }
0x1772   :  { %v2401_v11 = vmul.f32 0.5, %v2399_v10  ;;  %v2402_v12 = vmul.f32 %v2400_v9, %v2380_v56 }
0x1774   :  { %v2403_v13 = vmul.f32 %v2401_v11, %v2383_v60  ;;  %v3154_v60 = vld [vmem:[%s3848_s22 + $0x8] sm:$0xff]   ;;  %s3249_s22 = smov [#allocation2]  }
0x1775   :  { %s2685_s26 = sshll.u32 %s3249_s22, 4  ;;  %s2686_s26 = int_to_ptr.vmem [resolvable:$true] %s2685_s26 }
0x1776   :  { %v2404_v15 = vpack.c.bf16 %v2403_v13, %v2402_v12  ;;  %s3217_s21 = scalar_lea.vmem %s2686_s26, 32  ;;  %p3222_p1 = scmp.lt.s32.totalorder %s2686_s26, %s2686_s26 }
0x1777   :  { %p3218_p0 = scmp.ne.s32.totalorder %s2686_s26, %s3217_s21  ;;  %p3223_p2 = scmp.lt.s32.totalorder %s3217_s21, %s3217_s21 }
0x1778   :  { %3077 = vmatmul.mubr.msk.bf16.vlgmr.msra.gmra.mrb[44].mxu1 %vm1326_vm8, %v2404_v15 }
0x1779   :  { %p3224_p3 = por %p3223_p2, %p3222_p1 }
0x177b   :  { %p3225_p4 = pnand %p3224_p3, %p3218_p0 }
0x184b   :  { %v2483_v19 = vpop.f32.mrb[44].mxu1 }
0x184c   :  { %v3078_v20 = vpop.f32.mrb[45].mxu1  ;;  %v2484_v18 = vadd.f32 %v2790_v16, %v2483_v19 }
0x184d   :  { %v2486_v17 = vpop.f32.mrb[46].mxu1 }
0x184e   :  { %v2487_v21 = vadd.f32 %v2790_v16, %v2486_v17  ;;  %v3079_v22 = vpop.f32.mrb[47].mxu1  ;;  %v2490_v26 = vadd.f32 %v2484_v18, %v2314_v49  ;;  %v2798_v49 = vld [vmem:[%s3844_s18 + $0x1] ss:$0 sm:$0xff] }
0x1850   :  { %v2491_v23 = vadd.f32 %v2487_v21, %v2315_v50  ;;  %v2496_v28 = vsel %vm241_vm4, %v2490_v26, 0.0 }
0x1852   :  { %v2499_v25 = vsel %vm241_vm4, %v2491_v23, 0.0 }
0x1853   :  { %2500 = vadd.xlane.f32.xlu0 %v2499_v25 }
0x1857   :  { %2497 = vadd.xlane.f32.xlu0 %v2496_v28 }
0x18e0   :  { %v2501_v30 = vpop.xlane.xlu0 %2500 }
0x18e1   :  { %v2503_v31 = vmul.f32 0.03125, %v2501_v30 }
0x18e3   :  { %v2505_v46 = vsub.f32 %v2491_v23, %v2503_v31 }
0x18e4   :  { %v2498_v47 = vpop.xlane.xlu0 %2497 }
0x18e5   :  { %v2502_v32 = vmul.f32 0.03125, %v2498_v47  ;;  %v2507_v33 = vmul.f32 %v2505_v46, %v2505_v46 }
0x18e7   :  { %v2504_v34 = vsub.f32 %v2490_v26, %v2502_v32  ;;  %v2511_v35 = vsel %vm241_vm4, %v2507_v33, 0.0 }
0x18e8   :  { %2512 = vadd.xlane.f32.xlu1 %v2511_v35 }
0x18e9   :  { %v2506_v36 = vmul.f32 %v2504_v34, %v2504_v34 }
0x18eb   :  { %v2508_v37 = vsel %vm241_vm4, %v2506_v36, 0.0 }
0x18ec   :  { %2509 = vadd.xlane.f32.xlu0 %v2508_v37 }
0x1975   :  { %v2513_v40 = vpop.xlane.xlu1 %2512 }
0x1976   :  { %v2515_v41 = vmul.f32 0.03125, %v2513_v40 }
0x1978   :  { %v2517_v24 = vadd.f32 1e-12, %v2515_v41 }
0x1979   :  { %v2510_v42 = vpop.xlane.xlu0 %2509 }
0x197a   :  { %3211 = vrsqrt.f32 %v2517_v24  ;;  %v2514_v43 = vmul.f32 0.03125, %v2510_v42 }
0x197c   :  { %v2516_v44 = vadd.f32 1e-12, %v2514_v43 }
0x197e   :  { %3213 = vrsqrt.f32 %v2516_v44 }
0x1984   :  { %v3212_v45 = vpop.eup %3211 }
0x1985   :  { %v2521_v50 = vmul.f32 %v3212_v45, %v2505_v46 }
0x1987   :  { %v2529_v48 = vmul.f32 %v2798_v49, %v2521_v50 }
0x1988   :  { %v3214_v52 = vpop.eup %3213 }
0x1989   :  { %v2537_v27 = vadd.f32 %v2799_v29, %v2529_v48  ;;  %v2520_v53 = vmul.f32 %v3214_v52, %v2504_v34 }
0x198b   :  { %v2528_v54 = vmul.f32 %v2798_v49, %v2520_v53  ;;  %v2539_v55 = vrot.slane %v2537_v27, 7 }
0x198d   :  { %v2536_v56 = vadd.f32 %v2799_v29, %v2528_v54 }
0x198f   :  { %v2542_v57 = vsel %vm2541_vm9, %v2536_v56, %v2539_v55 }
0x1990   :  { %v2543_v58 = vpack.c.bf16 %v2542_v57, %v2542_v57 }
0x1992   :  { %3085 = vmatmul.mubr.msk.bf16.vlgmr.msra.gmra.mrb[28].mxu0 %vm241_vm4, %v2543_v58 }
0x1993   :  { %3092 = vmatprep.mubr.msk.bf16.mxu0 %vm3243_vm5, %v3242_v14  ;;  %3089 = vmatpush3.bf16.msra.mxu0 %v3153_v59 }
0x1994   :  { %3090 = vmatprep.subr.bf16.mxu0 %v3242_v14  ;;  %v2804_v14 = vld [vmem:[%s3849_s23] ss:$0 sm:$0xff] }
0x1997   :  { %3091 = vmatpush3.bf16.msra.mxu0 %v3154_v60 }
0x1a65   :  { %v2604_v62 = vpop.f32.mrb[28].mxu0 }
0x1a66   :  { %v2605_v63 = vadd.f32 %v2800_v61, %v2604_v62  ;;  %v3086_v51 = vpop.f32.mrb[29].mxu0 }
0x1a67   :  { %v2607_v0 = vpop.f32.mrb[30].mxu0 }
0x1a68   :  { %3215 = vtanh.f32 %v2605_v63  ;;  %v3087_v1 = vpop.f32.mrb[31].mxu0 }
0x1a72   :  { %v3216_v2 = vpop.eup %3215 }
0x1a73   :  { %v2611_v3 = vpack.c.bf16 %v3216_v2, %v3216_v2 }
0x1a75   :  { %3093 = vmatmul.mubr.msk.bf16.vlgmr.msra.gmra.mrb[32].mxu0 %vm241_vm4, %v2611_v3 }
0x1b48   :  { %v2672_v4 = vpop.f32.mrb[32].mxu0 }
0x1b49   :  { %v2673_v5 = vadd.f32 %v2804_v14, %v2672_v4  ;;  %v3094_v6 = vpop.f32.mrb[33].mxu0 }
0x1b4a   :  { %v2675_v7 = vpop.f32.mrb[34].mxu0 }
0x1b4b   :  { %2678 = vst [vmem:[#allocation2] sm:$0x3] %v2673_v5  ;;  %v3095_v8 = vpop.f32.mrb[35].mxu0 }
0x1b4c   :  { %3228 = shalt.err (!%p3225_p4)
}
0x1b4d   :  { %s3229_s23 = scalar_lea.hbm %s3850_s24, 32 }
0x1b4e   :  { %p3230_p5 = scmp.ne.s32.totalorder %s3850_s24, %s3229_s23  ;;  %p3233_p6 = scmp.lt.u32.totalorder %s3229_s23, %s3850_s24 }
0x1b50   :  { %p3235_p7 = pnand %p3233_p6, %p3230_p5 }
0x1b52   :  { %3238 = shalt.err (!%p3235_p7)
}
0x1b53   :  { %2688 = dma.vmem_to_hbm [thread:$0]  %s2686_s26, 32, %s3850_s24, [#allocation3]  }
0x1b54   :  { %3239 = dma.done.wait [#allocation3], 32  }
0x1b55   :  { %3240 = vsyncadd [#allocation3], 4294967264 }
0x1b56   :  { %2692 = vsyncpa [#allocation3], 1 }

</bundles_post_ra>
